<compile_context>
chip_gen: v5e
topology: v5e:2x2
jax: 0.10.0
libtpu: 0.0.40
codegen_flags: <defaults>
</compile_context>

<pallas_src>
import jax
import jax.numpy as jnp
import numpy as np
from jax import lax
from jax.experimental import pallas as pl
from jax.experimental.pallas import tpu as pltpu

KSIZE = 31
RAD = 15
POOL_DIV = float(KSIZE ** 3)
SMOOTH = 1e-5
NSTATS = 5          # bce_sum, inter_w, union_w, inter_p, union_p
STAT_LANES = 128    # lane-dense per-volume stat columns per stat


def _band_np(n, radius):
    """(n, n) 0/1 band matrix: band[i, j] = |i - j| <= radius (exact in f32)."""
    i = np.arange(n)[:, None]
    j = np.arange(n)[None, :]
    return (np.abs(i - j) <= radius).astype(np.float32)


def _vmem_work_budget():
    """Per-step working-set budget for TB selection (binding case: v7x, 64 MiB)."""
    try:
        cap = pltpu.get_tpu_info().vmem_capacity_bytes
    except Exception:
        cap = 64 * 1024 * 1024          # assume the smallest generation if query fails
    return int(max(8 * 1024 * 1024, min(24 * 1024 * 1024, cap // 5)))


def _choose_tb(b, d, hw, g_cap=128):
    """Volumes per grid step.

    Constraints: TB divides B; the (TB, 5*128) out block is legal (TB % 8 == 0 or
    TB == B); G = TB*D <= g_cap so the block-diagonal depth matmul is a single
    MXU K-pass on every generation; per-step working set within a conservative
    (generation-aware) VMEM budget.  Preference: largest TB that still yields
    >= 8 grid steps (>= 4 per core on a 2-core v7x), else >= 4, else largest.
    """
    budget = _vmem_work_budget()

    def fits(tb):
        g = tb * d
        blk = tb * d * hw * 4
        work = (4 * blk                       # x, t input blocks, double-buffered
                + 8 * blk                     # in-kernel temporaries
                + 2 * 4 * (g * g + hw * hw)   # pooling matrices (2 buffers each)
                + 2 * NSTATS * tb * STAT_LANES * 4)
        return work <= budget

    legal = [tb for tb in range(1, b + 1)
             if b % tb == 0 and (tb % 8 == 0 or tb == b)]
    cands = [tb for tb in legal if tb * d <= g_cap and fits(tb)]
    if not cands:
        # Guard (review): never silently pick an unchecked TB == B block; fall
        # back to the smallest legal divisor instead.
        return min(legal)
    for min_steps in (8, 4, 1):
        ok = [tb for tb in cands if b // tb >= min_steps]
        if ok:
            return max(ok)
    return max(cands)


def _make_kernel(tb, d, hw):
    g = tb * d

    def kernel(x_ref, t_ref, bd_ref, bhw_ref, o_ref):
        # x_ref/t_ref: (TB, D, H*W) logits / targets for TB (n, c) volumes.
        x2 = x_ref[...].reshape(g, hw)
        t2 = t_ref[...].reshape(g, hw)

        # --- separable avg_pool3d(kernel=31, stride=1, pad=15, count_include_pad) ---
        # depth: one block-diagonal (I_TB (x) Bd) left-multiply, lanes stay H*W
        pd = jnp.dot(bd_ref[...], t2, preferred_element_type=jnp.float32)      # (G, HW)
        # height+width fused: one (HW, HW) Kronecker (Bh (x) Bw) right-multiply
        pool = jnp.dot(pd, bhw_ref[...],
                       preferred_element_type=jnp.float32) * (1.0 / POOL_DIV)  # (G, HW)

        weit = 1.0 + 5.0 * jnp.abs(pool - t2)

        # BCE-with-logits (PyTorch formula) and sigmoid sharing one exp per element;
        # the divide is a single approximate EUP reciprocal.
        e = jnp.exp(-jnp.abs(x2))
        bce = jnp.maximum(x2, 0.0) - x2 * t2 + jnp.log(1.0 + e)
        inv = pl.reciprocal(1.0 + e, approx=True)
        pred = jnp.where(x2 >= 0.0, inv, e * inv)

        pt = pred * t2
        pu = pred + t2

        def per_vol(a):                       # (G, HW) -> (TB, 1) per-volume sums
            a3 = a.reshape(tb, d, hw)
            s = jnp.sum(jnp.sum(a3, axis=2, keepdims=True), axis=1, keepdims=True)
            return s.reshape(tb, 1)

        stats = (bce, pt * weit, pu * weit, pt, pu)
        for i, a in enumerate(stats):         # packed (TB, 5*128) lane-dense output
            o_ref[:, i * STAT_LANES:(i + 1) * STAT_LANES] = jnp.broadcast_to(
                per_vol(a), (tb, STAT_LANES))

    return kernel


def hybrid_loss(x, t, smooth=SMOOTH):
    """Pallas implementation of HybridLoss.forward(input, target)."""
    N, C, D, H, W = x.shape
    B, HW = N * C, H * W
    xs = x.reshape(B, D, HW).astype(jnp.float32)
    ts = t.reshape(B, D, HW).astype(jnp.float32)

    TB = _choose_tb(B, D, HW)
    G = TB * D

    bd_blk = jnp.asarray(np.kron(np.eye(TB, dtype=np.float32), _band_np(D, RAD)))  # (G, G)
    # TODO(synk): for H*W beyond ~2K lanes the (HW, HW) Kronecker operand gets too
    # large -- fall back to separable H and W matmuls in that regime.
    bhw = jnp.asarray(np.kron(_band_np(H, RAD), _band_np(W, RAD)))                 # (HW, HW)

    block_bytes = TB * D * HW * 4
    vmem_est = (4 * block_bytes                       # x, t blocks (double-buffered)
                + 8 * block_bytes                     # in-kernel temporaries
                + 2 * 4 * (G * G + HW * HW)           # pooling matrices (2 buffers)
                + 2 * NSTATS * TB * STAT_LANES * 4)   # packed stat output
    vmem_limit = int(min(48 * 1024 * 1024, max(24 * 1024 * 1024, 3 * vmem_est)))

    out = pl.pallas_call(
        _make_kernel(TB, D, HW),
        out_shape=jax.ShapeDtypeStruct((B, NSTATS * STAT_LANES), jnp.float32),
        grid_spec=pltpu.PrefetchScalarGridSpec(
            num_scalar_prefetch=0,
            grid=(B // TB,),
            in_specs=[
                pl.BlockSpec((TB, D, HW), lambda b: (b, 0, 0)),
                pl.BlockSpec((TB, D, HW), lambda b: (b, 0, 0)),
                pl.BlockSpec((G, G), lambda b: (0, 0)),
                pl.BlockSpec((HW, HW), lambda b: (0, 0)),
            ],
            out_specs=pl.BlockSpec((TB, NSTATS * STAT_LANES), lambda b: (b, 0)),
        ),
        compiler_params=pltpu.CompilerParams(
            dimension_semantics=("parallel",),
            vmem_limit_bytes=vmem_limit),
    )(xs, ts, bd_blk, bhw)

    s_bce = out[:, 0 * STAT_LANES]
    s_iw = out[:, 1 * STAT_LANES]
    s_uw = out[:, 2 * STAT_LANES]
    s_ip = out[:, 3 * STAT_LANES]
    s_up = out[:, 4 * STAT_LANES]

    vol = D * H * W
    # F.binary_cross_entropy_with_logits(..., reduce=None) -> reduction='mean',
    # i.e. one scalar; (weit * scalar).sum / weit.sum == scalar per (n, c).
    wbce_scalar = jnp.sum(s_bce) / (B * vol)
    wiou = 1.0 - (s_iw + 1.0) / (s_uw - s_iw + 1.0)

    inter2 = s_ip + smooth / 2.0
    union2 = s_up + smooth
    dice = 2.0 * inter2 / union2
    iou = inter2 / (union2 - inter2)

    total_loss = wbce_scalar + jnp.mean(wiou)
    dice_out = dice.reshape(N, C).mean(axis=0)
    iou_out = iou.reshape(N, C).mean(axis=0)
    return total_loss, dice_out, iou_out


def hybrid_loss_ref(x, t, smooth=SMOOTH):
    """Pure-JAX reference of the PyTorch forward (for validation)."""
    pool = lax.reduce_window(
        t, 0.0, lax.add,
        (1, 1, KSIZE, KSIZE, KSIZE), (1, 1, 1, 1, 1),
        [(0, 0), (0, 0), (RAD, RAD), (RAD, RAD), (RAD, RAD)]) / POOL_DIV
    weit = 1 + 5 * jnp.abs(pool - t)
    bce = jnp.maximum(x, 0.0) - x * t + jnp.log1p(jnp.exp(-jnp.abs(x)))
    wbce_scalar = jnp.mean(bce)
    wbce = (weit * wbce_scalar).sum(axis=(2, 3, 4)) / weit.sum(axis=(2, 3, 4))
    pred = jax.nn.sigmoid(x)
    inter = (pred * t * weit).sum(axis=(2, 3, 4))
    union = ((pred + t) * weit).sum(axis=(2, 3, 4))
    wiou = 1 - (inter + 1) / (union - inter + 1)
    inter2 = (pred * t).sum(axis=(2, 3, 4)) + smooth / 2
    union2 = (pred + t).sum(axis=(2, 3, 4)) + smooth
    dice = 2 * inter2 / union2
    iou = inter2 / (union2 - inter2)
    return (wbce + wiou).mean(), dice.mean(axis=0), iou.mean(axis=0)


if __name__ == "__main__":
    key = jax.random.PRNGKey(0)
    k1, k2 = jax.random.split(key)
    N, C, D, H, W = 8, 8, 8, 16, 16
    logits = jax.random.normal(k1, (N, C, D, H, W), dtype=jnp.float32)
    target = jax.random.uniform(k2, (N, C, D, H, W), dtype=jnp.float32)

    total, dice, iou = jax.block_until_ready(hybrid_loss(logits, target))
    total_r, dice_r, iou_r = hybrid_loss_ref(logits, target)

    # 2e-3 tolerance: pred uses the approximate EUP reciprocal (per perf review).
    assert np.allclose(np.asarray(total), np.asarray(total_r), rtol=2e-3, atol=2e-3)
    assert np.allclose(np.asarray(dice), np.asarray(dice_r), rtol=2e-3, atol=2e-3)
    assert np.allclose(np.asarray(iou), np.asarray(iou_r), rtol=2e-3, atol=2e-3)
    print("KERNEL_OK")
</pallas_src>

<mosaic_0001>
module attributes {stable_mosaic.version = 11 : i64} {
  func.func @kernel(%arg0: i32, %arg1: memref<8x8x256xf32, #tpu.memory_space<vmem>>, %arg2: memref<8x8x256xf32, #tpu.memory_space<vmem>>, %arg3: memref<64x64xf32, #tpu.memory_space<vmem>>, %arg4: memref<256x256xf32, #tpu.memory_space<vmem>>, %arg5: memref<8x640xf32, #tpu.memory_space<vmem>>) attributes {dimension_semantics = [#tpu.dimension_semantics<parallel>], iteration_bounds = array<i64: 8>, scalar_prefetch = 0 : i64, scratch_operands = 0 : i64, tpu.core_type = #tpu.core_type<tc>, window_params = [{transform_indices = @transform_0, window_bounds = array<i64: 8, 8, 256>}, {transform_indices = @transform_1, window_bounds = array<i64: 8, 8, 256>}, {pipeline_mode = #tpu.pipeline_mode<synchronous>, transform_indices = @transform_2, window_bounds = array<i64: 64, 64>}, {pipeline_mode = #tpu.pipeline_mode<synchronous>, transform_indices = @transform_3, window_bounds = array<i64: 256, 256>}, {transform_indices = @transform_4, window_bounds = array<i64: 8, 640>}]} {
    %c0 = arith.constant 0 : index
    %c0_0 = arith.constant 0 : index
    %c0_1 = arith.constant 0 : index
    %0 = vector.load %arg1[%c0, %c0_0, %c0_1] : memref<8x8x256xf32, #tpu.memory_space<vmem>>, vector<8x8x256xf32>
    %1 = vector.shape_cast %0 : vector<8x8x256xf32> to vector<64x256xf32>
    %c0_2 = arith.constant 0 : index
    %c0_3 = arith.constant 0 : index
    %c0_4 = arith.constant 0 : index
    %2 = vector.load %arg2[%c0_2, %c0_3, %c0_4] : memref<8x8x256xf32, #tpu.memory_space<vmem>>, vector<8x8x256xf32>
    %3 = vector.shape_cast %2 : vector<8x8x256xf32> to vector<64x256xf32>
    %c0_5 = arith.constant 0 : index
    %c0_6 = arith.constant 0 : index
    %4 = vector.load %arg3[%c0_5, %c0_6] : memref<64x64xf32, #tpu.memory_space<vmem>>, vector<64x64xf32>
    %cst = arith.constant dense<0.000000e+00> : vector<64x256xf32>
    %5 = tpu.matmul %4, %3, %cst {dimension_numbers = #tpu.dot_dimension_numbers<[1], [0], [0], [1], [0, 0, 1, 1], [], []>} : vector<64x64xf32>, vector<64x256xf32>, vector<64x256xf32> -> vector<64x256xf32>
    %c0_7 = arith.constant 0 : index
    %c0_8 = arith.constant 0 : index
    %6 = vector.load %arg4[%c0_7, %c0_8] : memref<256x256xf32, #tpu.memory_space<vmem>>, vector<256x256xf32>
    %cst_9 = arith.constant dense<0.000000e+00> : vector<64x256xf32>
    %7 = tpu.matmul %5, %6, %cst_9 {dimension_numbers = #tpu.dot_dimension_numbers<[1], [0], [0], [1], [0, 0, 1, 1], [], []>} : vector<64x256xf32>, vector<256x256xf32>, vector<64x256xf32> -> vector<64x256xf32>
    %cst_10 = arith.constant 3.3567183E-5 : f32
    %8 = vector.broadcast %cst_10 : f32 to vector<64x256xf32>
    %9 = arith.mulf %7, %8 : vector<64x256xf32>
    %10 = arith.subf %9, %3 : vector<64x256xf32>
    %11 = math.absf %10 : vector<64x256xf32>
    %cst_11 = arith.constant 5.000000e+00 : f32
    %12 = vector.broadcast %cst_11 : f32 to vector<64x256xf32>
    %13 = arith.mulf %12, %11 : vector<64x256xf32>
    %cst_12 = arith.constant 1.000000e+00 : f32
    %14 = vector.broadcast %cst_12 : f32 to vector<64x256xf32>
    %15 = arith.addf %14, %13 : vector<64x256xf32>
    %16 = math.absf %1 : vector<64x256xf32>
    %cst_13 = arith.constant 0.000000e+00 : f32
    %17 = vector.broadcast %cst_13 : f32 to vector<64x256xf32>
    %18 = arith.subf %17, %16 : vector<64x256xf32>
    %19 = math.exp %18 : vector<64x256xf32>
    %cst_14 = arith.constant 0.000000e+00 : f32
    %20 = vector.broadcast %cst_14 : f32 to vector<64x256xf32>
    %21 = arith.maximumf %1, %20 : vector<64x256xf32>
    %22 = arith.mulf %1, %3 : vector<64x256xf32>
    %23 = arith.subf %21, %22 : vector<64x256xf32>
    %cst_15 = arith.constant 1.000000e+00 : f32
    %24 = vector.broadcast %cst_15 : f32 to vector<64x256xf32>
    %25 = arith.addf %24, %19 : vector<64x256xf32>
    %26 = math.log %25 : vector<64x256xf32>
    %27 = arith.addf %23, %26 : vector<64x256xf32>
    %cst_16 = arith.constant 1.000000e+00 : f32
    %28 = vector.broadcast %cst_16 : f32 to vector<64x256xf32>
    %29 = arith.addf %28, %19 : vector<64x256xf32>
    %30 = tpu.reciprocal %29 {approx = true} : vector<64x256xf32> -> vector<64x256xf32>
    %cst_17 = arith.constant 0.000000e+00 : f32
    %31 = vector.broadcast %cst_17 : f32 to vector<64x256xf32>
    %32 = arith.cmpf oge, %1, %31 : vector<64x256xf32>
    %33 = arith.mulf %19, %30 : vector<64x256xf32>
    %34 = arith.select %32, %30, %33 : vector<64x256xi1>, vector<64x256xf32>
    %35 = arith.mulf %34, %3 : vector<64x256xf32>
    %36 = arith.addf %34, %3 : vector<64x256xf32>
    %37 = arith.mulf %35, %15 : vector<64x256xf32>
    %38 = arith.mulf %36, %15 : vector<64x256xf32>
    %39 = vector.shape_cast %27 : vector<64x256xf32> to vector<8x8x256xf32>
    %cst_18 = arith.constant dense<0.000000e+00> : vector<8x8xf32>
    %40 = vector.multi_reduction <add>, %39, %cst_18 [2] : vector<8x8x256xf32> to vector<8x8xf32>
    %41 = vector.shape_cast %40 : vector<8x8xf32> to vector<8x8x1xf32>
    %cst_19 = arith.constant dense<0.000000e+00> : vector<8x1xf32>
    %42 = vector.multi_reduction <add>, %41, %cst_19 [1] : vector<8x8x1xf32> to vector<8x1xf32>
    %43 = vector.shape_cast %42 : vector<8x1xf32> to vector<8x1x1xf32>
    %44 = vector.shape_cast %43 : vector<8x1x1xf32> to vector<8x1xf32>
    %45 = vector.shape_cast %44 : vector<8x1xf32> to vector<8x1xf32>
    %46 = vector.broadcast %45 : vector<8x1xf32> to vector<8x128xf32>
    %c0_20 = arith.constant 0 : index
    %c0_21 = arith.constant 0 : index
    %47 = vector.load %arg5[%c0_20, %c0_21] : memref<8x640xf32, #tpu.memory_space<vmem>>, vector<8x128xf32>
    tpu.vector_store %arg5[%c0_20, %c0_21], %46 {strides = array<i32>} : memref<8x640xf32, #tpu.memory_space<vmem>>, vector<8x128xf32>,
    %48 = vector.shape_cast %37 : vector<64x256xf32> to vector<8x8x256xf32>
    %cst_22 = arith.constant dense<0.000000e+00> : vector<8x8xf32>
    %49 = vector.multi_reduction <add>, %48, %cst_22 [2] : vector<8x8x256xf32> to vector<8x8xf32>
    %50 = vector.shape_cast %49 : vector<8x8xf32> to vector<8x8x1xf32>
    %cst_23 = arith.constant dense<0.000000e+00> : vector<8x1xf32>
    %51 = vector.multi_reduction <add>, %50, %cst_23 [1] : vector<8x8x1xf32> to vector<8x1xf32>
    %52 = vector.shape_cast %51 : vector<8x1xf32> to vector<8x1x1xf32>
    %53 = vector.shape_cast %52 : vector<8x1x1xf32> to vector<8x1xf32>
    %54 = vector.shape_cast %53 : vector<8x1xf32> to vector<8x1xf32>
    %55 = vector.broadcast %54 : vector<8x1xf32> to vector<8x128xf32>
    %c0_24 = arith.constant 0 : index
    %c128 = arith.constant 128 : index
    %56 = vector.load %arg5[%c0_24, %c128] : memref<8x640xf32, #tpu.memory_space<vmem>>, vector<8x128xf32>
    tpu.vector_store %arg5[%c0_24, %c128], %55 {strides = array<i32>} : memref<8x640xf32, #tpu.memory_space<vmem>>, vector<8x128xf32>,
    %57 = vector.shape_cast %38 : vector<64x256xf32> to vector<8x8x256xf32>
    %cst_25 = arith.constant dense<0.000000e+00> : vector<8x8xf32>
    %58 = vector.multi_reduction <add>, %57, %cst_25 [2] : vector<8x8x256xf32> to vector<8x8xf32>
    %59 = vector.shape_cast %58 : vector<8x8xf32> to vector<8x8x1xf32>
    %cst_26 = arith.constant dense<0.000000e+00> : vector<8x1xf32>
    %60 = vector.multi_reduction <add>, %59, %cst_26 [1] : vector<8x8x1xf32> to vector<8x1xf32>
    %61 = vector.shape_cast %60 : vector<8x1xf32> to vector<8x1x1xf32>
    %62 = vector.shape_cast %61 : vector<8x1x1xf32> to vector<8x1xf32>
    %63 = vector.shape_cast %62 : vector<8x1xf32> to vector<8x1xf32>
    %64 = vector.broadcast %63 : vector<8x1xf32> to vector<8x128xf32>
    %c0_27 = arith.constant 0 : index
    %c256 = arith.constant 256 : index
    %65 = vector.load %arg5[%c0_27, %c256] : memref<8x640xf32, #tpu.memory_space<vmem>>, vector<8x128xf32>
    tpu.vector_store %arg5[%c0_27, %c256], %64 {strides = array<i32>} : memref<8x640xf32, #tpu.memory_space<vmem>>, vector<8x128xf32>,
    %66 = vector.shape_cast %35 : vector<64x256xf32> to vector<8x8x256xf32>
    %cst_28 = arith.constant dense<0.000000e+00> : vector<8x8xf32>
    %67 = vector.multi_reduction <add>, %66, %cst_28 [2] : vector<8x8x256xf32> to vector<8x8xf32>
    %68 = vector.shape_cast %67 : vector<8x8xf32> to vector<8x8x1xf32>
    %cst_29 = arith.constant dense<0.000000e+00> : vector<8x1xf32>
    %69 = vector.multi_reduction <add>, %68, %cst_29 [1] : vector<8x8x1xf32> to vector<8x1xf32>
    %70 = vector.shape_cast %69 : vector<8x1xf32> to vector<8x1x1xf32>
    %71 = vector.shape_cast %70 : vector<8x1x1xf32> to vector<8x1xf32>
    %72 = vector.shape_cast %71 : vector<8x1xf32> to vector<8x1xf32>
    %73 = vector.broadcast %72 : vector<8x1xf32> to vector<8x128xf32>
    %c0_30 = arith.constant 0 : index
    %c384 = arith.constant 384 : index
    %74 = vector.load %arg5[%c0_30, %c384] : memref<8x640xf32, #tpu.memory_space<vmem>>, vector<8x128xf32>
    tpu.vector_store %arg5[%c0_30, %c384], %73 {strides = array<i32>} : memref<8x640xf32, #tpu.memory_space<vmem>>, vector<8x128xf32>,
    %75 = vector.shape_cast %36 : vector<64x256xf32> to vector<8x8x256xf32>
    %cst_31 = arith.constant dense<0.000000e+00> : vector<8x8xf32>
    %76 = vector.multi_reduction <add>, %75, %cst_31 [2] : vector<8x8x256xf32> to vector<8x8xf32>
    %77 = vector.shape_cast %76 : vector<8x8xf32> to vector<8x8x1xf32>
    %cst_32 = arith.constant dense<0.000000e+00> : vector<8x1xf32>
    %78 = vector.multi_reduction <add>, %77, %cst_32 [1] : vector<8x8x1xf32> to vector<8x1xf32>
    %79 = vector.shape_cast %78 : vector<8x1xf32> to vector<8x1x1xf32>
    %80 = vector.shape_cast %79 : vector<8x1x1xf32> to vector<8x1xf32>
    %81 = vector.shape_cast %80 : vector<8x1xf32> to vector<8x1xf32>
    %82 = vector.broadcast %81 : vector<8x1xf32> to vector<8x128xf32>
    %c0_33 = arith.constant 0 : index
    %c512 = arith.constant 512 : index
    %83 = vector.load %arg5[%c0_33, %c512] : memref<8x640xf32, #tpu.memory_space<vmem>>, vector<8x128xf32>
    tpu.vector_store %arg5[%c0_33, %c512], %82 {strides = array<i32>} : memref<8x640xf32, #tpu.memory_space<vmem>>, vector<8x128xf32>,
    return
  }
  func.func @transform_0(%arg0: i32) -> (i32, i32, i32) {
    %c0_i32 = arith.constant 0 : i32
    %c0_i32_0 = arith.constant 0 : i32
    %c0_i32_1 = arith.constant 0 : i32
    return %arg0, %c0_i32, %c0_i32_0 : i32, i32, i32
  }
  func.func @transform_1(%arg0: i32) -> (i32, i32, i32) {
    %c0_i32 = arith.constant 0 : i32
    %c0_i32_0 = arith.constant 0 : i32
    %c0_i32_1 = arith.constant 0 : i32
    return %arg0, %c0_i32, %c0_i32_0 : i32, i32, i32
  }
  func.func @transform_2(%arg0: i32) -> (i32, i32) {
    %c0_i32 = arith.constant 0 : i32
    %c0_i32_0 = arith.constant 0 : i32
    %c0_i32_1 = arith.constant 0 : i32
    return %c0_i32, %c0_i32_0 : i32, i32
  }
  func.func @transform_3(%arg0: i32) -> (i32, i32) {
    %c0_i32 = arith.constant 0 : i32
    %c0_i32_0 = arith.constant 0 : i32
    %c0_i32_1 = arith.constant 0 : i32
    return %c0_i32, %c0_i32_0 : i32, i32
  }
  func.func @transform_4(%arg0: i32) -> (i32, i32) {
    %c0_i32 = arith.constant 0 : i32
    %c0_i32_0 = arith.constant 0 : i32
    return %arg0, %c0_i32 : i32, i32
  }
}

</mosaic_0001>

<bundles_post_ra>
// kernel: tpu_custom_call.1
= control target key start
LH: loop header
LB: loop body
LE: loop exit
PB: predicated region body
PF: predicated region fallthrough
CT: control target
= control target key end

     0   :  { %s2986_s0 = inlined_call_operand.hbm [shape: f32[64,8,256], index: 0, kind: input, shape index: {}]   ;;  %s2987_s1 = inlined_call_operand.hbm [shape: f32[64,8,256], index: 1, kind: input, shape index: {}]   ;;  %s2988_s2 = inlined_call_operand.hbm [shape: f32[64,64], index: 2, kind: input, shape index: {}]   ;;  %s2989_s3 = inlined_call_operand.hbm [shape: f32[256,256], index: 3, kind: input, shape index: {}]   ;;  %s2990_s4 = inlined_call_operand.hbm [shape: f32[64,640], index: 4, kind: output, shape index: {}]  }
   0x1   :  { %3005 = sst [smem:[#allocation22_spill]] %s2986_s0 }
   0x2   :  { %3006 = sst [smem:[#allocation23_spill]] %s2988_s2 }
   0x3   :  { %3007 = sst [smem:[#allocation24_spill]] %s2989_s3 }
   0x4   :  { %9 = vsyncpa [#allocation3], 0 }
   0x5   :  { %11 = vsyncpa [#allocation3 + $0x1], 0 }
   0x6   :  { %12 = vsyncpa [#allocation6], 0 }
   0x7   :  { %14 = vsyncpa [#allocation6 + $0x1], 0 }
   0x8   :  { %15 = vsyncpa [#allocation9], 0 }
   0x9   :  { %16 = vsyncpa [#allocation4], 0 }
   0xa   :  { %18 = vsyncpa [#allocation4 + $0x1], 0  ;;  %s2115_s15 = smov 0   ;;  %s2117_s16 = smov 0  }
   0xb   :  { %s2119_s17 = smov 0   ;;  %s2121_s18 = smov 0  }
   0xc LB: > { %s2136_s19 = sadd.s32 4294967295, %s2082_s18   ;;  %s1637_s20 = sadd.s32 4294967294, %s2082_s18   ;;  %s2082_s18 = sphi %s2121_s18, %s3041_s18   ;;  %s2078_s17 = sphi %s2119_s17, %s3040_s17   ;;  %s2074_s16 = sphi %s2117_s16, %s3039_s16   ;;  %s2070_s15 = sphi %s2115_s15, %s3038_s15  }
   0xd   : > { %p44_p0 = scmp.ne.s32.totalorder %s2074_s16, %s2070_s15  ;;  %p45_p1 = scmp.eq.s32.totalorder %s2136_s19, 0 }
   0xe   : > { %p136_p2 = scmp.eq.s32.totalorder %s2136_s19, 7  ;;  %p142_p3 = scmp.eq.s32.totalorder %s1637_s20, 7 }
   0xf   : > { %p2145_p4 = por %p45_p1, %p44_p0  ;;  %p1638_p5 = scmp.ge.s32.totalorder %s2082_s18, 1 }
  0x10   : > { %p2150_p6 = por %p142_p3, %p44_p0  ;;  %p149_p7 = scmp.lt.s32.totalorder %s2082_s18, 9 }
  0x11   : > { %s3010_s2 = sld [smem:[#allocation23_spill]]  ;;  %s2084_s27 = smov [#allocation7]  }
  0x12   : > { %p2158_p8 = pnand %p1638_p5, %p149_p7  ;;  %s162_s28 = sshll.u32 %s2084_s27, 4  ;;  %s163_s28 = int_to_ptr.vmem [resolvable:$true] %s162_s28 }
  0x13   : > { %s3012_s3 = sld [smem:[#allocation24_spill]]  ;;  %s2085_s6 = smov 128  }
  0x14   : > { %p1710_p9 = pneg %p2158_p8  ;;  %s2086_s7 = smov 8  }
  0x15   : > { %s2087_s8 = smov [#allocation8]   ;;  %s2991_s10 = smov 256  }
  0x16   : > { %p1711_p10 = pnand %p1710_p9, %p45_p1  ;;  %s176_s9 = sshll.u32 %s2087_s8, 4  ;;  %s177_s9 = int_to_ptr.vmem [resolvable:$true] %s176_s9 }
  0x17   : > { %s160_s25 = sshll.u32 %s3010_s2, 4  ;;  %s2993_s11 = smov 16   ;;  %s161_s25 = int_to_ptr.hbm [resolvable:$true] %s160_s25 }
  0x18   : > { %1713 = dma.hbm_to_vmem [thread:$0]  (!%p1711_p10), %s161_s25, 1024, %s163_s28, [#allocation6], %s2085_s6, %s2085_s6, %s2086_s7  }
  0x19   : > { %s174_s5 = sshll.u32 %s3012_s3, 4  ;;  %s2173_s12 = sadd.s32 1, %s2082_s18   ;;  %s175_s5 = int_to_ptr.hbm [resolvable:$true] %s174_s5 }
  0x1a   : > { %1716 = dma.hbm_to_vmem [thread:$0]  (!%p1711_p10), %s175_s5, 8192, %s177_s9, [#allocation9], %s2991_s10, %s2991_s10, %s2993_s11  }
  0x1b   : > { %s28_s13 = ssub.s32 %s2082_s18, %s2173_s12  ;;  %s31_s14 = sadd.s32 1, %s2078_s17 }
  0x1c   : > { %p29_p11 = scmp.eq.s32.totalorder %s28_s13, 0  ;;  %p38_p12 = scmp.ne.s32.totalorder %s2078_s17, %s2074_s16 }
  0x1d   : > { %p39_p13 = scmp.eq.s32.totalorder %s2082_s18, 0  ;;  %p1730_p5 = scmp.lt.s32.totalorder %s2082_s18, 8 }
  0x1e   : > { %s2182_s20 = scalar_select %p29_p11, %s2078_s17, %s31_s14  }
  0x1f   : > { %p40_p0 = por %p39_p13, %p38_p12  ;;  %p2186_p3 = por %p136_p2, %p38_p12 }
  0x20   : > { %s190_s24 = sand.u32 1, %s2078_s17   ;;  %s1675_s27 = sshll.u32 %s2082_s18, 7 }
  0x21   : > { %s2192_s25 = sshll.u32 %s190_s24, 7  ;;  %s3014_s0 = sld [smem:[#allocation22_spill]] }
  0x22   : > { %s194_s5 = scalar_lea.vmem [#allocation2], %s2192_s25  ;;  %p2199_p7 = pnand %p1730_p5, %p40_p0 }
  0x23   : > { %s203_s6 = sshll.u32 %s194_s5, 4  ;;  %s223_s14 = scalar_lea.hbm %s2987_s1, %s1675_s27  ;;  %s204_s6 = int_to_ptr.vmem [resolvable:$true] %s203_s6 }
  0x24   : > { %s224_s10 = sshll.u32 %s223_s14, 4  ;;  %s191_s11 = scalar_lea.sflag [#allocation3], %s190_s24  ;;  %s225_s10 = int_to_ptr.hbm [resolvable:$true] %s224_s10 }
  0x25   : > { %p1948_p9 = pneg %p2199_p7 }
  0x27   : > { %s200_s30 = scalar_lea.hbm %s3014_s0, %s1675_s27  ;;  %s1951_s5 = scalar_lea.hbm %s3014_s0, 1024 }
  0x28   : > { %s201_s7 = sshll.u32 %s200_s30, 4  ;;  %s202_s7 = int_to_ptr.hbm [resolvable:$true] %s201_s7 }
  0x29   : > { %s1944_s2 = sshra.s32 %s202_s7, 4  ;;  %s1945_s2 = int_to_ptr.hbm [resolvable:$true] %s1944_s2 }
  0x2a   : > { %s1946_s28 = scalar_lea.hbm %s1945_s2, 128  ;;  %p1952_p12 = scmp.lt.s32.totalorder %s1945_s2, %s3014_s0 }
  0x2b   : > { %p1947_p2 = scmp.ne.s32.totalorder %s1945_s2, %s1946_s28  ;;  %p1953_p13 = scmp.lt.s32.totalorder %s1951_s5, %s1946_s28 }
  0x2d   : > { %p1949_p10 = pnand %p1948_p9, %p1947_p2  ;;  %p1954_p0 = por %p1953_p13, %p1952_p12 }
  0x2f   : > { %p1950_p11 = pneg %p1949_p10 }
  0x31   : > { %p1955_p5 = pnand %p1954_p0, %p1950_p11 }
  0x33   : > { %1958 = shalt.err (!%p1955_p5)
}
  0x34   : > { %s3016_s24 = smov 16   ;;  %s3017_s27 = smov 256  }
  0x35   : > { %1720 = dma.hbm_to_vmem [thread:$0]  (!%p2199_p7), %s202_s7, 2048, %s204_s6, %s191_s11, %s3017_s27, %s3017_s27, %s3016_s24  }
  0x36   : > { %s217_s14 = scalar_lea.vmem [#allocation5], %s2192_s25  ;;  %s213_s30 = sand.u32 1, %s2082_s18  }
  0x37   : > { %s226_s29 = sshll.u32 %s217_s14, 4  ;;  %s214_s9 = scalar_lea.sflag [#allocation6], %s213_s30  ;;  %s227_s29 = int_to_ptr.vmem [resolvable:$true] %s226_s29 }
  0x38   : > { %s1974_s2 = sshra.s32 %s225_s10, 4  ;;  %s1981_s0 = scalar_lea.hbm %s2987_s1, 1024  ;;  %s1975_s2 = int_to_ptr.hbm [resolvable:$true] %s1974_s2 }
  0x39   : > { %s1976_s28 = scalar_lea.hbm %s1975_s2, 128  ;;  %p1982_p12 = scmp.lt.s32.totalorder %s1975_s2, %s2987_s1 }
  0x3a   : > { %p1977_p2 = scmp.ne.s32.totalorder %s1975_s2, %s1976_s28  ;;  %p1983_p13 = scmp.lt.s32.totalorder %s1981_s0, %s1976_s28 }
  0x3c   : > { %p1979_p10 = pnand %p1977_p2, %p1948_p9  ;;  %p1984_p0 = por %p1983_p13, %p1982_p12 }
  0x3e   : > { %p1980_p11 = pneg %p1979_p10 }
  0x40   : > { %p1985_p5 = pnand %p1984_p0, %p1980_p11 }
  0x42   : > { %1988 = shalt.err (!%p1985_p5)
}
  0x43   : > { %1723 = dma.hbm_to_vmem [thread:$0]  (!%p2199_p7), %s225_s10, 2048, %s227_s29, %s214_s9, %s3017_s27, %s3017_s27, %s3016_s24  }
  0x44   : > { %238 = sbr.rel (%p2158_p8) target bundleno = 571 (0x23b), region = 36 }
  0x49   : > { %s2241_s25 = sand.u32 1, %s2074_s16  }
  0x4a   : > { %s1651_s3 = sshll.u32 %s2241_s25, 7  ;;  %s241_s0 = scalar_lea.sflag [#allocation3], %s2241_s25 }
  0x4b   : > { %s2245_s6 = scalar_lea.vmem [#allocation2], %s1651_s3 }
  0x4c   : > { %2049 = dma.done.wait (%p2145_p4), %s241_s0, 2048  }
  0x4d   : > { %2051 = vsyncadd (%p2145_p4), %s241_s0, 4294965248  ;;  %s250_s10 = sand.u32 1, %s2136_s19   ;;  %s2252_s7 = scalar_lea.vmem [#allocation5], %s1651_s3 }
  0x4e   : > { %s251_s26 = scalar_lea.sflag [#allocation6], %s250_s10 }
  0x4f   : > { %2053 = dma.done.wait (%p2145_p4), %s251_s26, 2048  }
  0x50   : > { %2055 = vsyncadd (%p2145_p4), %s251_s26, 4294965248 }
  0x51   : > { %2057 = dma.done.wait (%p45_p1), [#allocation6], 1024  }
  0x52   : > { %2059 = vsyncadd (%p45_p1), [#allocation6], 4294966272 }
  0x53   : > { %2061 = dma.done.wait (%p45_p1), [#allocation9], 8192  }
  0x54   : > { %2063 = vsyncadd (%p45_p1), [#allocation9], 4294959104  ;;  %v327_v0 = vld [vmem:[%s2252_s7 + $0x70] sm:$0xff]  ;;  %v328_v1 = vld [vmem:[%s2252_s7 + $0x78] sm:$0xff]  ;;  %vm337_vm0 = vcmask 523264   ;;  %s1694_s21 = smul.u32 40, %s2241_s25 }
  0x55   : > { %v2269_v2 = vld [vmem:[%s2252_s7 + $0x60] sm:$0xff]  ;;  %370 = vmatpush.msra.mxu0 %v327_v0  ;;  %411 = vmatpush.msra.mxu1 %v328_v1  ;;  %v2272_v3 = vld [vmem:[%s2252_s7 + $0x68] sm:$0xff]  ;;  %v2275_v4 = vld [vmem:[%s2252_s7 + $0x50] sm:$0xff]  ;;  %s1695_s24 = smul.u32 40, %s2136_s19  ;;  %s1509_s9 = scalar_lea.sflag [#allocation4], %s2241_s25 }
  0x56   : > { %v2278_v5 = vld [vmem:[%s2252_s7 + $0x58] sm:$0xff]  ;;  %1678 = vmatpush.msra.mxu2 %v327_v0  ;;  %1686 = vmatpush.msra.mxu3 %v328_v1  ;;  %v2283_v6 = vld [vmem:[%s2252_s7 + $0x40] sm:$0xff]  ;;  %v2286_v7 = vld [vmem:[%s2252_s7 + $0x48] sm:$0xff]  ;;  %s2875_s8 = scalar_lea.vmem [#allocation10], %s1694_s21  ;;  %s2024_s11 = scalar_lea.hbm %s2990_s4, 320 }
  0x57   : > { %371 = vmatpush.msra.mxu0 %v2269_v2  ;;  %412 = vmatpush.msra.mxu1 %v2272_v3  ;;  %v2293_v8 = vld [vmem:[%s2252_s7 + $0x30] sm:$0xff]  ;;  %v2296_v9 = vld [vmem:[%s2252_s7 + $0x38] sm:$0xff]  ;;  %v2303_v10 = vld [vmem:[%s2252_s7 + $0x20] sm:$0xff]  ;;  %s1520_s14 = scalar_lea.hbm %s2990_s4, %s1695_s24  ;;  %s1522_s29 = sshll.u32 %s2875_s8, 4  ;;  %s1523_s29 = int_to_ptr.vmem [resolvable:$true] %s1522_s29 }
  0x58   : > { %1679 = vmatpush.msra.mxu2 %v2269_v2  ;;  %1687 = vmatpush.msra.mxu3 %v2272_v3  ;;  %v2306_v11 = vld [vmem:[%s2252_s7 + $0x28] sm:$0xff]  ;;  %v2313_v12 = vld [vmem:[%s2252_s7 + $0x10] sm:$0xff]  ;;  %v2316_v13 = vld [vmem:[%s2252_s7 + $0x18] sm:$0xff]  ;;  %s1524_s30 = sshll.u32 %s1520_s14, 4  ;;  %s1525_s30 = int_to_ptr.hbm [resolvable:$true] %s1524_s30 }
  0x59   : > { %372 = vmatpush.msra.mxu0 %v2275_v4  ;;  %413 = vmatpush.msra.mxu1 %v2278_v5  ;;  %v2323_v14 = vld [vmem:[%s2252_s7] sm:$0xff]  ;;  %v2326_v15 = vld [vmem:[%s2252_s7 + $0x8] sm:$0xff]  ;;  %v474_v18 = vld [vmem:[#allocation8 + $0xf0] sm:$0xff]  ;;  %s2018_s2 = sshra.s32 %s1525_s30, 4  ;;  %s2019_s2 = int_to_ptr.hbm [resolvable:$true] %s2018_s2 }
  0x5a   : > { %1680 = vmatpush.msra.mxu2 %v2275_v4  ;;  %1688 = vmatpush.msra.mxu3 %v2278_v5  ;;  %v329_v16 = vld [vmem:[#allocation7] sm:$0xff]  ;;  %v506_v19 = vld [vmem:[#allocation8 + $0x1f0] sm:$0xff]  ;;  %v475_v20 = vld [vmem:[#allocation8 + $0xf8] sm:$0xff]  ;;  %s2020_s28 = scalar_lea.hbm %s2019_s2, 40  ;;  %p2025_p7 = scmp.lt.s32.totalorder %s2019_s2, %s2990_s4 }
  0x5b   : > { %373 = vmatpush.msra.mxu0 %v2283_v6  ;;  %414 = vmatpush.msra.mxu1 %v2286_v7  ;;  %v333_v17 = vld [vmem:[#allocation7 + $0x20] sm:$0xff]  ;;  %v507_v21 = vld [vmem:[#allocation8 + $0x1f8] sm:$0xff]  ;;  %v473_v24 = vld [vmem:[#allocation8 + $0xe8] sm:$0xff]  ;;  %p2021_p1 = scmp.ne.s32.totalorder %s2019_s2, %s2020_s28  ;;  %p2026_p9 = scmp.lt.s32.totalorder %s2024_s11, %s2020_s28 }
  0x5c   : > { %1681 = vmatpush.msra.mxu2 %v2283_v6  ;;  %1689 = vmatpush.msra.mxu3 %v2286_v7  ;;  %v472_v22 = vld [vmem:[#allocation8 + $0xe0] sm:$0xff]  ;;  %v505_v25 = vld [vmem:[#allocation8 + $0x1e8] sm:$0xff]  ;;  %v470_v26 = vld [vmem:[#allocation8 + $0xd0] sm:$0xff] }
  0x5d   : > { %374 = vmatpush.msra.mxu0 %v2293_v8  ;;  %415 = vmatpush.msra.mxu1 %v2296_v9  ;;  %v504_v23 = vld [vmem:[#allocation8 + $0x1e0] sm:$0xff]  ;;  %v502_v27 = vld [vmem:[#allocation8 + $0x1d0] sm:$0xff]  ;;  %v330_v28 = vld [vmem:[#allocation7 + $0x8] sm:$0xff]  ;;  %p2022_p4 = pnand %p2021_p1, %p2186_p3  ;;  %p2027_p2 = por %p2026_p9, %p2025_p7 }
  0x5e   : > { %1682 = vmatpush.msra.mxu2 %v2293_v8  ;;  %1690 = vmatpush.msra.mxu3 %v2296_v9  ;;  %v471_v29 = vld [vmem:[#allocation8 + $0xd8] sm:$0xff]  ;;  %v334_v31 = vld [vmem:[#allocation7 + $0x28] sm:$0xff]  ;;  %v468_v32 = vld [vmem:[#allocation8 + $0xc0] sm:$0xff] }
  0x5f   : > { %375 = vmatpush.msra.mxu0 %v2303_v10  ;;  %416 = vmatpush.msra.mxu1 %v2306_v11  ;;  %v503_v30 = vld [vmem:[#allocation8 + $0x1d8] sm:$0xff]  ;;  %v500_v33 = vld [vmem:[#allocation8 + $0x1c0] sm:$0xff]  ;;  %v469_v34 = vld [vmem:[#allocation8 + $0xc8] sm:$0xff]  ;;  %p2023_p8 = pneg %p2022_p4 }
  0x60   : > { %1683 = vmatpush.msra.mxu2 %v2303_v10  ;;  %1691 = vmatpush.msra.mxu3 %v2306_v11  ;;  %v501_v35 = vld [vmem:[#allocation8 + $0x1c8] sm:$0xff]  ;;  %v466_v36 = vld [vmem:[#allocation8 + $0xb0] sm:$0xff]  ;;  %v467_v38 = vld [vmem:[#allocation8 + $0xb8] sm:$0xff] }
  0x61   : > { %376 = vmatpush.msra.mxu0 %v2313_v12  ;;  %417 = vmatpush.msra.mxu1 %v2316_v13  ;;  %v498_v37 = vld [vmem:[#allocation8 + $0x1b0] sm:$0xff]  ;;  %v499_v39 = vld [vmem:[#allocation8 + $0x1b8] sm:$0xff]  ;;  %v464_v40 = vld [vmem:[#allocation8 + $0xa0] sm:$0xff]  ;;  %p2028_p10 = pnand %p2027_p2, %p2023_p8 }
  0x62   : > { %1684 = vmatpush.msra.mxu2 %v2313_v12  ;;  %1692 = vmatpush.msra.mxu3 %v2316_v13  ;;  %v496_v41 = vld [vmem:[#allocation8 + $0x1a0] sm:$0xff]  ;;  %v331_v42 = vld [vmem:[#allocation7 + $0x10] sm:$0xff]  ;;  %v465_v43 = vld [vmem:[#allocation8 + $0xa8] sm:$0xff] }
  0x63   : > { %377 = vmatpush.msra.mxu0 %v2323_v14  ;;  %418 = vmatpush.msra.mxu1 %v2326_v15  ;;  %v497_v44 = vld [vmem:[#allocation8 + $0x1a8] sm:$0xff]  ;;  %v335_v45 = vld [vmem:[#allocation7 + $0x30] sm:$0xff]  ;;  %v463_v48 = vld [vmem:[#allocation8 + $0x98] sm:$0xff] }
  0x64   : > { %1655 = vmatmul.msk.f32.vlgmr.msra.gmra.mxu0 %vm337_vm0, %v329_v16  ;;  %1663 = vmatmul.msk.f32.vlgmr.msra.gmra.mxu1 %vm337_vm0, %v329_v16  ;;  %v462_v46 = vld [vmem:[#allocation8 + $0x90] sm:$0xff]  ;;  %v495_v49 = vld [vmem:[#allocation8 + $0x198] sm:$0xff]  ;;  %v460_v50 = vld [vmem:[#allocation8 + $0x80] sm:$0xff] }
  0x65   : > { %1685 = vmatpush.msra.mxu2 %v2323_v14  ;;  %1693 = vmatpush.msra.mxu3 %v2326_v15  ;;  %v494_v47 = vld [vmem:[#allocation8 + $0x190] sm:$0xff]  ;;  %v492_v51 = vld [vmem:[#allocation8 + $0x180] sm:$0xff]  ;;  %v461_v52 = vld [vmem:[#allocation8 + $0x88] sm:$0xff] }
  0x66   : > { %1659 = vmatmul.msk.f32.vlgmr.msra.gmra.mxu2 %vm337_vm0, %v333_v17  ;;  %1667 = vmatmul.msk.f32.vlgmr.msra.gmra.mxu3 %vm337_vm0, %v333_v17  ;;  %v493_v53 = vld [vmem:[#allocation8 + $0x188] sm:$0xff]  ;;  %v458_v54 = vld [vmem:[#allocation8 + $0x70] sm:$0xff]  ;;  %v332_v56 = vld [vmem:[#allocation7 + $0x18] sm:$0xff] }
  0x67   : > { %508 = vmatpush.msrb.mxu2 %v474_v18  ;;  %549 = vmatpush.msrb.mxu3 %v506_v19  ;;  %v490_v55 = vld [vmem:[#allocation8 + $0x170] sm:$0xff]  ;;  %v459_v57 = vld [vmem:[#allocation8 + $0x78] sm:$0xff]  ;;  %v456_v60 = vld [vmem:[#allocation8 + $0x60] sm:$0xff] }
  0x68   : > { %590 = vmatpush.msrb.mxu0 %v475_v20  ;;  %631 = vmatpush.msrb.mxu1 %v507_v21  ;;  %v491_v58 = vld [vmem:[#allocation8 + $0x178] sm:$0xff]  ;;  %v488_v61 = vld [vmem:[#allocation8 + $0x160] sm:$0xff]  ;;  %v457_v62 = vld [vmem:[#allocation8 + $0x68] sm:$0xff] }
  0x69   : > { %509 = vmatpush.msrb.mxu2 %v472_v22  ;;  %550 = vmatpush.msrb.mxu3 %v504_v23  ;;  %v336_v59 = vld [vmem:[#allocation7 + $0x38] sm:$0xff]  ;;  %v489_v63 = vld [vmem:[#allocation8 + $0x168] sm:$0xff]  ;;  %v454_v0 = vld [vmem:[#allocation8 + $0x50] sm:$0xff] }
  0x6a   : > { %591 = vmatpush.msrb.mxu0 %v473_v24  ;;  %632 = vmatpush.msrb.mxu1 %v505_v25  ;;  %v486_v1 = vld [vmem:[#allocation8 + $0x150] sm:$0xff]  ;;  %v455_v16 = vld [vmem:[#allocation8 + $0x58] sm:$0xff]  ;;  %v452_v18 = vld [vmem:[#allocation8 + $0x40] sm:$0xff] }
  0x6b   : > { %510 = vmatpush.msrb.mxu2 %v470_v26  ;;  %551 = vmatpush.msrb.mxu3 %v502_v27  ;;  %v487_v17 = vld [vmem:[#allocation8 + $0x158] sm:$0xff]  ;;  %v484_v19 = vld [vmem:[#allocation8 + $0x140] sm:$0xff]  ;;  %v453_v20 = vld [vmem:[#allocation8 + $0x48] sm:$0xff] }
  0x6c   : > { %1656 = vmatmul.msk.f32.gmra.mxu0 %vm337_vm0, %v330_v28  ;;  %1664 = vmatmul.msk.f32.gmra.mxu1 %vm337_vm0, %v330_v28  ;;  %v485_v21 = vld [vmem:[#allocation8 + $0x148] sm:$0xff]  ;;  %v450_v22 = vld [vmem:[#allocation8 + $0x30] sm:$0xff]  ;;  %v451_v24 = vld [vmem:[#allocation8 + $0x38] sm:$0xff] }
  0x6d   : > { %592 = vmatpush.msrb.mxu0 %v471_v29  ;;  %633 = vmatpush.msrb.mxu1 %v503_v30  ;;  %v482_v23 = vld [vmem:[#allocation8 + $0x130] sm:$0xff]  ;;  %v483_v25 = vld [vmem:[#allocation8 + $0x138] sm:$0xff]  ;;  %v448_v26 = vld [vmem:[#allocation8 + $0x20] sm:$0xff] }
  0x6e   : > { %1660 = vmatmul.msk.f32.gmra.mxu2 %vm337_vm0, %v334_v31  ;;  %1668 = vmatmul.msk.f32.gmra.mxu3 %vm337_vm0, %v334_v31  ;;  %v480_v27 = vld [vmem:[#allocation8 + $0x120] sm:$0xff]  ;;  %v449_v28 = vld [vmem:[#allocation8 + $0x28] sm:$0xff]  ;;  %v446_v30 = vld [vmem:[#allocation8 + $0x10] sm:$0xff] }
  0x6f   : > { %511 = vmatpush.msrb.mxu2 %v468_v32  ;;  %552 = vmatpush.msrb.mxu3 %v500_v33  ;;  %v481_v29 = vld [vmem:[#allocation8 + $0x128] sm:$0xff]  ;;  %v478_v31 = vld [vmem:[#allocation8 + $0x110] sm:$0xff]  ;;  %v447_v32 = vld [vmem:[#allocation8 + $0x18] sm:$0xff] }
  0x70   : > { %593 = vmatpush.msrb.mxu0 %v469_v34  ;;  %634 = vmatpush.msrb.mxu1 %v501_v35  ;;  %v479_v33 = vld [vmem:[#allocation8 + $0x118] sm:$0xff]  ;;  %v444_v34 = vld [vmem:[#allocation8] sm:$0xff] }
  0x71   : > { %512 = vmatpush.msrb.mxu2 %v466_v36  ;;  %553 = vmatpush.msrb.mxu3 %v498_v37  ;;  %v476_v35 = vld [vmem:[#allocation8 + $0x100] sm:$0xff]  ;;  %v445_v36 = vld [vmem:[#allocation8 + $0x8] sm:$0xff] }
  0x72   : > { %594 = vmatpush.msrb.mxu0 %v467_v38  ;;  %635 = vmatpush.msrb.mxu1 %v499_v39  ;;  %v477_v37 = vld [vmem:[#allocation8 + $0x108] sm:$0xff] }
  0x73   : > { %513 = vmatpush.msrb.mxu2 %v464_v40  ;;  %554 = vmatpush.msrb.mxu3 %v496_v41 }
  0x74   : > { %1657 = vmatmul.msk.f32.gmra.mxu0 %vm337_vm0, %v331_v42  ;;  %1665 = vmatmul.msk.f32.gmra.mxu1 %vm337_vm0, %v331_v42 }
  0x75   : > { %595 = vmatpush.msrb.mxu0 %v465_v43  ;;  %636 = vmatpush.msrb.mxu1 %v497_v44  ;;  %v2355_v44 = vld [vmem:[%s2245_s6 + $0x40] sm:$0xff] }
  0x76   : > { %1661 = vmatmul.msk.f32.gmra.mxu2 %vm337_vm0, %v335_v45  ;;  %1669 = vmatmul.msk.f32.gmra.mxu3 %vm337_vm0, %v335_v45  ;;  %v2358_v45 = vld [vmem:[%s2245_s6 + $0x48] sm:$0xff]  ;;  %vm952_vm5 = vcmp.ge.f32.partialorder %v2355_v44, 0.0 }
  0x77   : > { %514 = vmatpush.msrb.mxu2 %v462_v46  ;;  %555 = vmatpush.msrb.mxu3 %v494_v47  ;;  %v2361_v46 = vld [vmem:[%s2245_s6] sm:$0xff]  ;;  %v760_v47 = vand.u32 2147483647, %v2355_v44  ;;  %vm953_vm6 = vcmp.ge.f32.partialorder %v2358_v45, 0.0 }
  0x78   : > { %596 = vmatpush.msrb.mxu0 %v463_v48  ;;  %637 = vmatpush.msrb.mxu1 %v495_v49  ;;  %v761_v48 = vand.u32 2147483647, %v2358_v45  ;;  %v2366_v49 = vld [vmem:[%s2245_s6 + $0x8] sm:$0xff]  ;;  %vm944_vm1 = vcmp.ge.f32.partialorder %v2361_v46, 0.0 }
  0x79   : > { %515 = vmatpush.msrb.mxu2 %v460_v50  ;;  %556 = vmatpush.msrb.mxu3 %v492_v51  ;;  %v752_v50 = vand.u32 2147483647, %v2361_v46  ;;  %v753_v51 = vand.u32 2147483647, %v2366_v49  ;;  %vm945_vm2 = vcmp.ge.f32.partialorder %v2366_v49, 0.0 }
  0x7a   : > { %597 = vmatpush.msrb.mxu0 %v461_v52  ;;  %638 = vmatpush.msrb.mxu1 %v493_v53  ;;  %v776_v52 = vsub.f32 0.0, %v760_v47  ;;  %v777_v53 = vsub.f32 0.0, %v761_v48 }
  0x7b   : > { %516 = vmatpush.msrb.mxu2 %v458_v54  ;;  %557 = vmatpush.msrb.mxu3 %v490_v55  ;;  %v768_v54 = vsub.f32 0.0, %v752_v50  ;;  %v769_v55 = vsub.f32 0.0, %v753_v51 }
  0x7c   : > { %1658 = vmatmul.msk.f32.gmra.mxu0 %vm337_vm0, %v332_v56  ;;  %1666 = vmatmul.msk.f32.gmra.mxu1 %vm337_vm0, %v332_v56  ;;  %v800_v56 = vmul.f32 1.442695, %v776_v52 }
  0x7d   : > { %598 = vmatpush.msrb.mxu0 %v459_v57  ;;  %639 = vmatpush.msrb.mxu1 %v491_v58  ;;  %v802_v57 = vmul.f32 1.442695, %v777_v53  ;;  %v784_v58 = vmul.f32 1.442695, %v768_v54  ;;  %v833_v53 = vmul.f32 %v2326_v15, %v2366_v49 }
  0x7e   : > { %1662 = vmatmul.msk.f32.gmra.mxu2 %vm337_vm0, %v336_v59  ;;  %1670 = vmatmul.msk.f32.gmra.mxu3 %vm337_vm0, %v336_v59  ;;  %1772 = vpow2.f32 %v800_v56 }
  0x7f   : > { %517 = vmatpush.msrb.mxu2 %v456_v60  ;;  %558 = vmatpush.msrb.mxu3 %v488_v61  ;;  %v786_v61 = vmul.f32 1.442695, %v769_v55  ;;  %1774 = vpow2.f32 %v802_v57 }
  0x80   : > { %599 = vmatpush.msrb.mxu0 %v457_v62  ;;  %640 = vmatpush.msrb.mxu1 %v489_v63  ;;  %1776 = vpow2.f32 %v784_v58 }
  0x81   : > { %518 = vmatpush.msrb.mxu2 %v454_v0  ;;  %559 = vmatpush.msrb.mxu3 %v486_v1  ;;  %v2371_v0 = vld [vmem:[%s2245_s6 + $0x50] sm:$0xff]  ;;  %v2374_v1 = vld [vmem:[%s2245_s6 + $0x58] sm:$0xff]  ;;  %1778 = vpow2.f32 %v786_v61 }
  0x82   : > { %600 = vmatpush.msrb.mxu0 %v455_v16  ;;  %641 = vmatpush.msrb.mxu1 %v487_v17  ;;  %3018 = vst [vmem:[#allocation16_spill] sm:$0xff] %v2374_v1  ;;  %v762_v16 = vand.u32 2147483647, %v2371_v0  ;;  %v2378_v17 = vld [vmem:[%s2245_s6 + $0x10] sm:$0xff]  ;;  %vm954_vm11 = vcmp.ge.f32.partialorder %v2371_v0, 0.0 }
  0x83   : > { %519 = vmatpush.msrb.mxu2 %v452_v18  ;;  %560 = vmatpush.msrb.mxu3 %v484_v19  ;;  %v763_v19 = vand.u32 2147483647, %v2374_v1  ;;  %vm946_vm3 = vcmp.ge.f32.partialorder %v2378_v17, 0.0 }
  0x84   : > { %601 = vmatpush.msrb.mxu0 %v453_v20  ;;  %642 = vmatpush.msrb.mxu1 %v485_v21  ;;  %v2380_v18 = vpop.eup %1772  ;;  %v2384_v20 = vld [vmem:[%s2245_s6 + $0x18] sm:$0xff] }
  0x85   : > { %520 = vmatpush.msrb.mxu2 %v450_v22  ;;  %561 = vmatpush.msrb.mxu3 %v482_v23  ;;  %v2386_v21 = vpop.eup %1774  ;;  %v2389_v22 = vadd.f32 1.0, %v2380_v18  ;;  %vm947_vm4 = vcmp.ge.f32.partialorder %v2384_v20, 0.0 }
  0x86   : > { %602 = vmatpush.msrb.mxu0 %v451_v24  ;;  %643 = vmatpush.msrb.mxu1 %v483_v25  ;;  %v2391_v23 = vpop.eup %1776  ;;  %v824_v24 = vmax.f32 %v2355_v44, 0.0  ;;  %v840_v25 = vmul.f32 %v2283_v6, %v2355_v44  ;;  %v825_v6 = vmax.f32 %v2358_v45, 0.0 }
  0x87   : > { %521 = vmatpush.msrb.mxu2 %v448_v26  ;;  %562 = vmatpush.msrb.mxu3 %v480_v27  ;;  %v2397_v26 = vadd.f32 1.0, %v2386_v21  ;;  %v754_v27 = vand.u32 2147483647, %v2378_v17  ;;  %1780 = vlog2.f32 %v2389_v22 }
  0x88   : > { %603 = vmatpush.msrb.mxu0 %v449_v28  ;;  %644 = vmatpush.msrb.mxu1 %v481_v29  ;;  %v864_v28 = vadd.f32 1.0, %v2391_v23  ;;  %v778_v29 = vsub.f32 0.0, %v762_v16 }
  0x89   : > { %522 = vmatpush.msrb.mxu2 %v446_v30  ;;  %563 = vmatpush.msrb.mxu3 %v478_v31  ;;  %v755_v30 = vand.u32 2147483647, %v2384_v20  ;;  %v2403_v31 = vpop.eup %1778  ;;  %1782 = vlog2.f32 %v2397_v26 }
  0x8a   : > { %604 = vmatpush.msrb.mxu0 %v447_v32  ;;  %645 = vmatpush.msrb.mxu1 %v479_v33  ;;  %v841_v32 = vmul.f32 %v2286_v7, %v2358_v45  ;;  %v779_v33 = vsub.f32 0.0, %v763_v19  ;;  %v856_v7 = vsub.f32 %v824_v24, %v840_v25  ;;  %1784 = vlog2.f32 %v864_v28 }
  0x8b   : > { %523 = vmatpush.msrb.mxu2 %v444_v34  ;;  %564 = vmatpush.msrb.mxu3 %v476_v35  ;;  %v804_v47 = vmul.f32 1.442695, %v778_v29 }
  0x8c   : > { %605 = vmatpush.msrb.mxu0 %v445_v36  ;;  %646 = vmatpush.msrb.mxu1 %v477_v37  ;;  %v865_v36 = vadd.f32 1.0, %v2403_v31  ;;  %v770_v37 = vsub.f32 0.0, %v754_v27  ;;  %v857_v48 = vsub.f32 %v825_v6, %v841_v32  ;;  %v806_v50 = vmul.f32 1.442695, %v779_v33 }
  0x8d   : > { %v1781_v52 = vpop.eup %1780 }
  0x8e   : > { %1786 = vlog2.f32 %v865_v36  ;;  %v788_v54 = vmul.f32 1.442695, %v770_v37  ;;  %v897_v57 = vmul.f32 0.6931472, %v1781_v52  ;;  %v2451_v52 = vld [vmem:[%s2245_s6 + $0x28] sm:$0xff] }
  0x8f   : > { %1788 = vrcp.f32 %v864_v28  ;;  %v1783_v56 = vpop.eup %1782  ;;  %vm949_vm8 = vcmp.ge.f32.partialorder %v2451_v52, 0.0 }
  0x90   : > { %1790 = vrcp.f32 %v865_v36  ;;  %v1785_v19 = vpop.eup %1784 }
  0x91   : > { %1792 = vpow2.f32 %v804_v47  ;;  %v881_v29 = vmul.f32 0.6931472, %v1785_v19 }
  0x92   : > { %1794 = vpow2.f32 %v806_v50 }
  0x93   : > { %1796 = vpow2.f32 %v788_v54 }
  0x94   : > { %v1787_v28 = vpop.eup %1786 }
  0x95   : > { %v2425_v6 = vpop.eup %1788  ;;  %v883_v37 = vmul.f32 0.6931472, %v1787_v28 }
  0xe1   : > { %v379_v38 = vpop.f32.mrf.mxu0  ;;  %v420_v39 = vpop.f32.mrf.mxu1 }
  0xe2   : > { %524 = vmatmul.f32.vlgmr.msrb.gmra.mxu2 %v379_v38  ;;  %565 = vmatmul.f32.vlgmr.msrb.gmra.mxu3 %v420_v39 }
  0xe3   : > { %606 = vmatmul.f32.vlgmr.msrb.gmra.mxu0 %v379_v38  ;;  %647 = vmatmul.f32.vlgmr.msrb.gmra.mxu1 %v420_v39  ;;  %v2411_v38 = vld [vmem:[%s2245_s6 + $0x60] sm:$0xff]  ;;  %v816_v39 = vmax.f32 %v2361_v46, 0.0 }
  0xe4   : > { %3019 = vst [vmem:[#allocation17_spill] sm:$0xff] %v2411_v38  ;;  %v764_v51 = vand.u32 2147483647, %v2411_v38 }
  0xe9   : > { %v382_v40 = vpop.f32.mrf.mxu0  ;;  %v423_v41 = vpop.f32.mrf.mxu1 }
  0xea   : > { %527 = vmatmul.f32.gmra.mxu2 %v382_v40  ;;  %568 = vmatmul.f32.gmra.mxu3 %v423_v41  ;;  %v391_v59 = vpop.f32.mrf.mxu2  ;;  %v432_v60 = vpop.f32.mrf.mxu3 }
  0xeb   : > { %609 = vmatmul.f32.gmra.mxu0 %v382_v40  ;;  %650 = vmatmul.f32.gmra.mxu1 %v423_v41  ;;  %v817_v40 = vmax.f32 %v2366_v49, 0.0  ;;  %v771_v41 = vsub.f32 0.0, %v755_v30  ;;  %v826_v30 = vmax.f32 %v2371_v0, 0.0 }
  0xed   : > { %v790_v58 = vmul.f32 1.442695, %v771_v41  ;;  %v849_v25 = vsub.f32 %v817_v40, %v833_v53  ;;  %v842_v40 = vmul.f32 %v2275_v4, %v2371_v0  ;;  %v843_v41 = vmul.f32 %v2278_v5, %v2374_v1 }
  0xee   : > { %v819_v5 = vmax.f32 %v2384_v20, 0.0 }
  0xef   : > { %1798 = vpow2.f32 %v790_v58  ;;  %v913_v47 = vadd.f32 %v883_v37, %v849_v25  ;;  %v858_v58 = vsub.f32 %v826_v30, %v842_v40  ;;  %v844_v25 = vmul.f32 %v2269_v2, %v2411_v38 }
  0xf0   : > { %v960_v37 = vmul.f32 %v2425_v6, %v2391_v23 }
  0xf1   : > { %v385_v42 = vpop.f32.mrf.mxu0  ;;  %v426_v43 = vpop.f32.mrf.mxu1 }
  0xf2   : > { %530 = vmatmul.f32.gmra.mxu2 %v385_v42  ;;  %571 = vmatmul.f32.gmra.mxu3 %v426_v43  ;;  %v394_v34 = vpop.f32.mrf.mxu2  ;;  %v435_v35 = vpop.f32.mrf.mxu3 }
  0xf3   : > { %612 = vmatmul.f32.gmra.mxu0 %v385_v42  ;;  %653 = vmatmul.f32.gmra.mxu1 %v426_v43  ;;  %v2416_v42 = vld [vmem:[%s2245_s6 + $0x68] sm:$0xff]  ;;  %v832_v43 = vmul.f32 %v2323_v14, %v2361_v46 }
  0xf4   : > { %v765_v55 = vand.u32 2147483647, %v2416_v42  ;;  %v845_v23 = vmul.f32 %v2272_v3, %v2416_v42  ;;  %vm957_vm14 = vcmp.ge.f32.partialorder %v2416_v42, 0.0 }
  0xf6   : > { %v781_v61 = vsub.f32 0.0, %v765_v55  ;;  %v835_v55 = vmul.f32 %v2316_v13, %v2384_v20 }
  0xf8   : > { %v810_v27 = vmul.f32 1.442695, %v781_v61  ;;  %v851_v30 = vsub.f32 %v819_v5, %v835_v55 }
  0xf9   : > { %v388_v62 = vpop.f32.mrf.mxu0  ;;  %v429_v63 = vpop.f32.mrf.mxu1 }
  0xfa   : > { %533 = vmatmul.f32.gmra.mxu2 %v388_v62  ;;  %574 = vmatmul.f32.gmra.mxu3 %v429_v63  ;;  %v397_v32 = vpop.f32.mrf.mxu2  ;;  %v438_v33 = vpop.f32.mrf.mxu3 }
  0xfb   : > { %615 = vmatmul.f32.gmra.mxu0 %v388_v62  ;;  %656 = vmatmul.f32.gmra.mxu1 %v429_v63  ;;  %v920_v62 = vadd.f32 %v897_v57, %v856_v7  ;;  %v848_v63 = vsub.f32 %v816_v39, %v832_v43  ;;  %v827_v39 = vmax.f32 %v2374_v1, 0.0  ;;  %v2435_v7 = vld [vmem:[%s2245_s6 + $0x20] sm:$0xff]  ;;  %v2506_v1 = vld [vmem:[%s2245_s6 + $0x78] sm:$0xff] }
  0xfc   : > { %vm948_vm7 = vcmp.ge.f32.partialorder %v2435_v7, 0.0  ;;  %vm959_vm15 = vcmp.ge.f32.partialorder %v2506_v1, 0.0 }
 0x102   : > { %536 = vmatmul.f32.gmra.mxu2 %v391_v59  ;;  %577 = vmatmul.f32.gmra.mxu3 %v432_v60  ;;  %v400_v40 = vpop.f32.mrf.mxu2 }
 0x103   : > { %618 = vmatmul.f32.gmra.mxu0 %v391_v59  ;;  %659 = vmatmul.f32.gmra.mxu1 %v432_v60  ;;  %v780_v59 = vsub.f32 0.0, %v764_v51  ;;  %v899_v60 = vmul.f32 0.6931472, %v1783_v56  ;;  %v834_v51 = vmul.f32 %v2313_v12, %v2378_v17  ;;  %v2462_v56 = vld [vmem:[%s2245_s6 + $0x30] sm:$0xff] }
 0x104   : > { %v838_v44 = vmul.f32 %v2293_v8, %v2462_v56  ;;  %vm950_vm9 = vcmp.ge.f32.partialorder %v2462_v56, 0.0 }
 0x105   : > { %v808_v16 = vmul.f32 1.442695, %v780_v59  ;;  %v921_v24 = vadd.f32 %v899_v60, %v857_v48  ;;  %v818_v48 = vmax.f32 %v2378_v17, 0.0  ;;  %v859_v59 = vsub.f32 %v827_v39, %v843_v41  ;;  %v441_v41 = vpop.f32.mrf.mxu3 }
 0x107   : > { %v1068_v36 = vadd.f32 %v921_v24, %v920_v62  ;;  %1800 = vpow2.f32 %v808_v16  ;;  %v2475_v16 = vld [vmem:[%s2245_s6 + $0x38] sm:$0xff]  ;;  %v828_v24 = vmax.f32 %v2411_v38, 0.0 }
 0x108   : > { %1802 = vpow2.f32 %v810_v27  ;;  %v758_v27 = vand.u32 2147483647, %v2462_v56  ;;  %v759_v2 = vand.u32 2147483647, %v2475_v16  ;;  %vm951_vm10 = vcmp.ge.f32.partialorder %v2475_v16, 0.0 }
 0x109   : > { %1804 = vrcp.f32 %v2389_v22  ;;  %1069 = vadd.xlane.f32.xlu2 %v1068_v36 }
 0x10a   : > { %539 = vmatmul.f32.gmra.mxu2 %v394_v34  ;;  %580 = vmatmul.f32.gmra.mxu3 %v435_v35  ;;  %1806 = vrcp.f32 %v2397_v26  ;;  %v756_v26 = vand.u32 2147483647, %v2435_v7  ;;  %v774_v55 = vsub.f32 0.0, %v758_v27 }
 0x10b   : > { %621 = vmatmul.f32.gmra.mxu0 %v394_v34  ;;  %662 = vmatmul.f32.gmra.mxu1 %v435_v35  ;;  %v2428_v34 = vpop.eup %1790  ;;  %v912_v35 = vadd.f32 %v881_v29, %v848_v63  ;;  %v757_v63 = vand.u32 2147483647, %v2451_v52  ;;  %v850_v29 = vsub.f32 %v818_v48, %v834_v51 }
 0x10c   : > { %v2437_v43 = vpop.eup %1792  ;;  %v796_v46 = vmul.f32 1.442695, %v774_v55 }
 0x10d   : > { %v2441_v50 = vpop.eup %1794  ;;  %v2445_v4 = vadd.f32 1.0, %v2437_v43  ;;  %v1056_v22 = vadd.f32 %v913_v47, %v912_v35  ;;  %v2496_v35 = vld [vmem:[%s2245_s6 + $0x70] sm:$0xff]  ;;  %v961_v47 = vmul.f32 %v2428_v34, %v2403_v31  ;;  %v773_v5 = vsub.f32 0.0, %v757_v63 }
 0x10e   : > { %3020 = vst [vmem:[#allocation18_spill] sm:$0xff] %v2441_v50  ;;  %v2453_v53 = vpop.eup %1796  ;;  %v2456_v54 = vadd.f32 1.0, %v2441_v50  ;;  %v766_v50 = vand.u32 2147483647, %v2496_v35  ;;  %vm958_vm0 = vcmp.ge.f32.partialorder %v2496_v35, 0.0 }
 0x10f   : > { %v2464_v57 = vpop.eup %1798  ;;  %1808 = vlog2.f32 %v2445_v4  ;;  %v866_v60 = vadd.f32 1.0, %v2453_v53  ;;  %1057 = vadd.xlane.f32.xlu0 %v1056_v22  ;;  %v860_v22 = vsub.f32 %v828_v24, %v844_v25  ;;  %v794_v24 = vmul.f32 1.442695, %v773_v5 }
 0x110   : > { %v2468_v61 = vpop.eup %1800  ;;  %1810 = vlog2.f32 %v2456_v54  ;;  %v867_v62 = vadd.f32 1.0, %v2464_v57 }
 0x111   : > { %3021 = vst [vmem:[#allocation19_spill] sm:$0xff] %v2468_v61  ;;  %v2477_v19 = vpop.eup %1802  ;;  %1812 = vlog2.f32 %v866_v60  ;;  %v2492_v39 = vadd.f32 1.0, %v2468_v61  ;;  %v775_v61 = vsub.f32 0.0, %v759_v2 }
 0x112   : > { %542 = vmatmul.f32.gmra.mxu2 %v397_v32  ;;  %583 = vmatmul.f32.gmra.mxu3 %v438_v33  ;;  %v2484_v28 = vpop.eup %1804  ;;  %1814 = vlog2.f32 %v867_v62  ;;  %v2501_v48 = vadd.f32 1.0, %v2477_v19 }
 0x113   : > { %624 = vmatmul.f32.gmra.mxu0 %v397_v32  ;;  %665 = vmatmul.f32.gmra.mxu1 %v438_v33  ;;  %v829_v32 = vmax.f32 %v2416_v42, 0.0  ;;  %v772_v33 = vsub.f32 0.0, %v756_v26  ;;  %v2487_v36 = vpop.eup %1806  ;;  %1816 = vrcp.f32 %v866_v60  ;;  %v2512_v60 = vsel %vm944_vm1, %v2425_v6, %v960_v37  ;;  %v2743_v42 = vld [vmem:[%s2252_s7 + $0x68] sm:$0xff] }
 0x114   : > { %1818 = vrcp.f32 %v867_v62  ;;  %v2518_v62 = vsel %vm945_vm2, %v2428_v34, %v961_v47  ;;  %v767_v6 = vand.u32 2147483647, %v2506_v1  ;;  %vm1136_vm1 = vcmask 1041409  }
 0x115   : > { %v1809_v51 = vpop.eup %1808  ;;  %1820 = vlog2.f32 %v2492_v39  ;;  %v792_v3 = vmul.f32 1.442695, %v772_v33  ;;  %v861_v2 = vsub.f32 %v829_v32, %v845_v23  ;;  %v2524_v33 = vmul.f32 %v2512_v60, %v2323_v14 }
 0x116   : > { %v1811_v26 = vpop.eup %1810  ;;  %v901_v38 = vmul.f32 0.6931472, %v1809_v51  ;;  %1822 = vlog2.f32 %v2501_v48  ;;  %vm1138_vm2 = vcmask 1042434  }
 0x117   : > { %v903_v31 = vmul.f32 0.6931472, %v1811_v26  ;;  %v1813_v25 = vpop.eup %1812  ;;  %1824 = vpow2.f32 %v792_v3 }
 0x118   : > { %v922_v63 = vadd.f32 %v901_v38, %v858_v58  ;;  %v1815_v37 = vpop.eup %1814  ;;  %v885_v51 = vmul.f32 0.6931472, %v1813_v25  ;;  %v798_v38 = vmul.f32 1.442695, %v775_v61  ;;  %v782_v58 = vsub.f32 0.0, %v766_v50 }
 0x119   : > { %v923_v27 = vadd.f32 %v903_v31, %v859_v59  ;;  %v1817_v49 = vpop.eup %1816  ;;  %1826 = vpow2.f32 %v794_v24  ;;  %v783_v61 = vsub.f32 0.0, %v767_v6  ;;  %v820_v31 = vmax.f32 %v2435_v7, 0.0 }
 0x11a   : > { %545 = vmatmul.f32.gmra.mxu2 %v400_v40  ;;  %586 = vmatmul.f32.gmra.mxu3 %v441_v41  ;;  %v1819_v59 = vpop.eup %1818  ;;  %v914_v32 = vadd.f32 %v885_v51, %v850_v29  ;;  %v962_v47 = vmul.f32 %v1817_v49, %v2453_v53  ;;  %1828 = vpow2.f32 %v796_v46  ;;  %v837_v46 = vmul.f32 %v2306_v11, %v2451_v52 }
 0x11b   : > { %627 = vmatmul.f32.gmra.mxu0 %v400_v40  ;;  %668 = vmatmul.f32.gmra.mxu1 %v441_v41  ;;  %v1071_v34 = vadd.f32 %v923_v27, %v922_v63  ;;  %v887_v40 = vmul.f32 0.6931472, %v1815_v37  ;;  %v2528_v41 = vmul.f32 %v2518_v62, %v2326_v15  ;;  %v1821_v5 = vpop.eup %1820  ;;  %v963_v50 = vmul.f32 %v1819_v59, %v2464_v57 }
 0x11c   : > { %v1823_v23 = vpop.eup %1822  ;;  %v905_v55 = vmul.f32 0.6931472, %v1821_v5  ;;  %1830 = vpow2.f32 %v798_v38  ;;  %v812_v15 = vmul.f32 1.442695, %v782_v58  ;;  %v978_v57 = vsel %vm946_vm3, %v1817_v49, %v962_v47 }
 0x11d   : > { %1072 = vadd.xlane.f32.xlu2 %v1071_v34  ;;  %v915_v14 = vadd.f32 %v887_v40, %v851_v30  ;;  %v907_v29 = vmul.f32 0.6931472, %v1823_v23  ;;  %1832 = vrcp.f32 %v2445_v4  ;;  %v1330_v53 = vadd.f32 %v2528_v41, %v2524_v33  ;;  %v2540_v3 = vpop.eup %1824 }
 0x11e   : > { %v924_v30 = vadd.f32 %v905_v55, %v860_v22  ;;  %v979_v20 = vsel %vm947_vm4, %v1819_v59, %v963_v50  ;;  %1834 = vpow2.f32 %v812_v15  ;;  %v814_v24 = vmul.f32 1.442695, %v783_v61 }
 0x11f   : > { %v1059_v26 = vadd.f32 %v915_v14, %v914_v32  ;;  %v925_v63 = vadd.f32 %v907_v29, %v861_v2  ;;  %v2542_v25 = vpop.eup %1826  ;;  %1836 = vrcp.f32 %v2456_v54  ;;  %v821_v4 = vmax.f32 %v2451_v52, 0.0 }
 0x120   : > { %v836_v27 = vmul.f32 %v2303_v10, %v2435_v7  ;;  %v868_v22 = vadd.f32 1.0, %v2540_v3  ;;  %v2549_v17 = vpop.eup %1828  ;;  %v869_v2 = vadd.f32 1.0, %v2542_v25  ;;  %v2555_v6 = vadd.f32 %v978_v57, %v2313_v12 }
 0x121   : > { %1060 = vadd.xlane.f32.xlu0 %v1059_v26  ;;  %1838 = vpow2.f32 %v814_v24  ;;  %v1074_v54 = vadd.f32 %v925_v63, %v924_v30  ;;  %v2560_v51 = vadd.f32 %v979_v20, %v2316_v13  ;;  %v870_v38 = vadd.f32 1.0, %v2549_v17 }
 0x122   : > { %v2557_v37 = vpop.eup %1830  ;;  %1840 = vlog2.f32 %v868_v22  ;;  %v852_v34 = vsub.f32 %v820_v31, %v836_v27  ;;  %v968_v40 = vmul.f32 %v2484_v28, %v2380_v18  ;;  %v969_v59 = vmul.f32 %v2487_v36, %v2386_v21 }
 0x123   : > { %1842 = vlog2.f32 %v869_v2  ;;  %v871_v58 = vadd.f32 1.0, %v2557_v37  ;;  %v2566_v49 = vpop.eup %1832  ;;  %v853_v47 = vsub.f32 %v821_v4, %v837_v46  ;;  %v822_v5 = vmax.f32 %v2462_v56, 0.0 }
 0x124   : > { %1844 = vrcp.f32 %v868_v22  ;;  %v2572_v32 = vpop.eup %1834  ;;  %v2583_v18 = vsel %vm952_vm5, %v2484_v28, %v968_v40  ;;  %v2586_v21 = vsel %vm953_vm6, %v2487_v36, %v969_v59  ;;  %v1422_v61 = vadd.f32 %v2560_v51, %v2555_v6 }
 0x125   : > { %1331 = vadd.xlane.f32.xlu2 %v1330_v53  ;;  %1846 = vrcp.f32 %v869_v2  ;;  %v2577_v45 = vpop.eup %1836  ;;  %v2580_v14 = vadd.f32 1.0, %v2572_v32  ;;  %v2593_v8 = vmul.f32 %v978_v57, %v2313_v12  ;;  %v2596_v23 = vmul.f32 %v979_v20, %v2316_v13 }
 0x126   : > { %1848 = vlog2.f32 %v870_v38  ;;  %v823_v28 = vmax.f32 %v2475_v16, 0.0  ;;  %v839_v36 = vmul.f32 %v2296_v9, %v2475_v16  ;;  %v854_v31 = vsub.f32 %v822_v5, %v838_v44 }
 0x127   : > { %v2588_v50 = vpop.eup %1838  ;;  %1850 = vlog2.f32 %v871_v58  ;;  %v1333_v9 = vadd.f32 %v2596_v23, %v2593_v8  ;;  %vm1140_vm3 = vcmask 1043459   ;;  %vm1142_vm4 = vcmask 1044484  }
 0x128   : > { %v1841_v55 = vpop.eup %1840  ;;  %1852 = vrcp.f32 %v870_v38  ;;  %v2602_v15 = vadd.f32 1.0, %v2588_v50  ;;  %v855_v24 = vsub.f32 %v823_v28, %v839_v36  ;;  %vm1144_vm5 = vcmask 1045509  }
 0x129   : > { %1075 = vadd.xlane.f32.xlu0 %v1074_v54  ;;  %v1843_v26 = vpop.eup %1842  ;;  %v889_v29 = vmul.f32 0.6931472, %v1841_v55  ;;  %1854 = vrcp.f32 %v871_v58  ;;  %v2640_v55 = vld [vmem:[%s2252_s7 + $0x78] sm:$0xff]  ;;  %vm1146_vm6 = vcmask 1046534  }
 0x12a   : > { %v1845_v12 = vpop.eup %1844  ;;  %v891_v53 = vmul.f32 0.6931472, %v1843_v26  ;;  %1856 = vlog2.f32 %v2580_v14  ;;  %v2649_v26 = vld [vmem:[%s2252_s7 + $0x30] sm:$0xff] }
 0x12b   : > { %v1847_v13 = vpop.eup %1846  ;;  %v916_v30 = vadd.f32 %v889_v29, %v852_v34  ;;  %v964_v57 = vmul.f32 %v1845_v12, %v2540_v3  ;;  %1858 = vlog2.f32 %v2602_v15  ;;  %v830_v3 = vmax.f32 %v2496_v35, 0.0 }
 0x12c   : > { %v1849_v63 = vpop.eup %1848  ;;  %v917_v20 = vadd.f32 %v891_v53, %v853_v47  ;;  %v965_v4 = vmul.f32 %v1847_v13, %v2542_v25  ;;  %v831_v25 = vmax.f32 %v2506_v1, 0.0  ;;  %v2634_v47 = vld [vmem:[%s2252_s7 + $0x70] sm:$0xff]  ;;  %1860 = vrcp.f32 %v2492_v39 }
 0x12d   : > { %1423 = vadd.xlane.f32.xlu2 %v1422_v61  ;;  %v1851_v27 = vpop.eup %1850  ;;  %v893_v22 = vmul.f32 0.6931472, %v1849_v63  ;;  %v2616_v46 = vsel %vm948_vm7, %v1845_v12, %v964_v57  ;;  %v846_v52 = vmul.f32 %v2634_v47, %v2496_v35  ;;  %v2666_v57 = vld [vmem:[%s2252_s7 + $0x40] sm:$0xff]  ;;  %1862 = vrcp.f32 %v2501_v48 }
 0x12e   : > { %v1853_v2 = vpop.eup %1852  ;;  %v1062_v54 = vadd.f32 %v917_v20, %v916_v30  ;;  %v895_v38 = vmul.f32 0.6931472, %v1851_v27  ;;  %v2621_v58 = vsel %vm949_vm8, %v1847_v13, %v965_v4  ;;  %v2627_v7 = vmul.f32 %v2616_v46, %v2303_v10  ;;  %v3022_v48 = vld [vmem:[#allocation18_spill] sm:$0xff] }
 0x12f   : > { %v1855_v34 = vpop.eup %1854  ;;  %v966_v40 = vmul.f32 %v1853_v2, %v2549_v17  ;;  %v2631_v59 = vmul.f32 %v2621_v58, %v2306_v11  ;;  %v918_v44 = vadd.f32 %v893_v22, %v854_v31  ;;  %v847_v10 = vmul.f32 %v2640_v55, %v2506_v1  ;;  %v2655_v31 = vld [vmem:[%s2252_s7 + $0x38] sm:$0xff] }
 0x130   : > { %v1857_v5 = vpop.eup %1856  ;;  %1063 = vadd.xlane.f32.xlu1 %v1062_v54  ;;  %v919_v61 = vadd.f32 %v895_v38, %v855_v24  ;;  %v967_v17 = vmul.f32 %v1855_v34, %v2557_v37  ;;  %v862_v53 = vsub.f32 %v830_v3, %v846_v52  ;;  %v2670_v63 = vmul.f32 %v2666_v57, %v2583_v18  ;;  %v2676_v24 = vld [vmem:[%s2252_s7 + $0x48] sm:$0xff] }
 0x131   : > { %1334 = vadd.xlane.f32.xlu0 %v1333_v9  ;;  %v1859_v28 = vpop.eup %1858  ;;  %v982_v11 = vsel %vm950_vm9, %v1853_v2, %v966_v40  ;;  %v1336_v12 = vadd.f32 %v2631_v59, %v2627_v7  ;;  %v863_v13 = vsub.f32 %v831_v25, %v847_v10  ;;  %v909_v30 = vmul.f32 0.6931472, %v1857_v5  ;;  %v3023_v2 = vld [vmem:[#allocation16_spill] sm:$0xff]  ;;  %v3024_v10 = vld [vmem:[#allocation19_spill] sm:$0xff] }
 0x132   : > { %v983_v36 = vsel %vm951_vm10, %v1855_v34, %v967_v17  ;;  %v2652_v29 = vmul.f32 %v2649_v26, %v982_v11  ;;  %v1065_v56 = vadd.f32 %v919_v61, %v918_v44  ;;  %v911_v16 = vmul.f32 0.6931472, %v1859_v28  ;;  %v1861_v34 = vpop.eup %1860  ;;  %v2699_v5 = vld [vmem:[%s2252_s7 + $0x50] sm:$0xff]  ;;  %v2709_v17 = vld [vmem:[%s2252_s7 + $0x58] sm:$0xff] }
 0x133   : > { %v2658_v37 = vmul.f32 %v2655_v31, %v983_v36  ;;  %v970_v20 = vmul.f32 %v2566_v49, %v2437_v43  ;;  %v2680_v4 = vmul.f32 %v2676_v24, %v2586_v21  ;;  %v2683_v39 = vadd.f32 %v2649_v26, %v982_v11  ;;  %v1863_v0 = vpop.eup %1862  ;;  %v1876_v11 = vld [vmem:[%s2252_s7] sm:$0xff] }
 0x134   : > { %v2686_v27 = vadd.f32 %v2655_v31, %v983_v36  ;;  %v926_v22 = vadd.f32 %v909_v30, %v862_v53  ;;  %v927_v43 = vadd.f32 %v911_v16, %v863_v13  ;;  %v971_v3 = vmul.f32 %v2577_v45, %v3022_v48  ;;  %v1877_v36 = vld [vmem:[%s2252_s7 + $0x8] sm:$0xff]  ;;  %v3025_v53 = vld [vmem:[#allocation17_spill] sm:$0xff]  ;;  %v2737_v16 = vld [vmem:[%s2252_s7 + $0x60] sm:$0xff] }
 0x135   : > { %v1339_v9 = vadd.f32 %v2658_v37, %v2652_v29  ;;  %vm955_vm12 = vcmp.ge.f32.partialorder %v3023_v2, 0.0  ;;  %v1342_v54 = vadd.f32 %v2680_v4, %v2670_v63  ;;  %v986_v25 = vsel %vm954_vm11, %v2566_v49, %v970_v20 }
 0x136   : > { %v1428_v38 = vadd.f32 %v2686_v27, %v2683_v39  ;;  %v1077_v40 = vadd.f32 %v927_v43, %v926_v22  ;;  %v987_v52 = vsel %vm955_vm12, %v2577_v45, %v971_v3  ;;  %v2702_v44 = vmul.f32 %v2699_v5, %v986_v25  ;;  %v2755_v43 = vld [vmem:[%s2252_s7 + $0x20] sm:$0xff]  ;;  %v1881_v3 = vld [vmem:[%s2252_s7 + $0x28] sm:$0xff] }
 0x137   : > { %1340 = vadd.xlane.f32.xlu2 %v1339_v9  ;;  %v2706_v61 = vadd.f32 %v2666_v57, %v2583_v18  ;;  %v2712_v49 = vmul.f32 %v2709_v17, %v987_v52  ;;  %v2716_v45 = vadd.f32 %v2676_v24, %v2586_v21  ;;  %v972_v28 = vmul.f32 %v1861_v34, %v3024_v10 }
 0x138   : > { %1066 = vadd.xlane.f32.xlu1 %v1065_v56  ;;  %v2721_v18 = vadd.f32 %v1876_v11, %v2512_v60  ;;  %vm956_vm13 = vcmp.ge.f32.partialorder %v3025_v53, 0.0  ;;  %v973_v56 = vmul.f32 %v1863_v0, %v2477_v19  ;;  %v2749_v20 = vadd.f32 %v2699_v5, %v986_v25 }
 0x139   : > { %1337 = vadd.xlane.f32.xlu0 %v1336_v12  ;;  %v2725_v12 = vadd.f32 %v1877_v36, %v2518_v62  ;;  %v1345_v21 = vadd.f32 %v2712_v49, %v2702_v44  ;;  %v1431_v13 = vadd.f32 %v2716_v45, %v2706_v61  ;;  %v988_v60 = vsel %vm956_vm13, %v1861_v34, %v972_v28 }
 0x13a   : > { %v989_v62 = vsel %vm957_vm14, %v1863_v0, %v973_v56  ;;  %v2740_v9 = vmul.f32 %v2737_v16, %v988_v60  ;;  %3028 = vst [vmem:[#allocation19_spill] sm:$0xff] %v2749_v20  ;;  %v2752_v22 = vadd.f32 %v2709_v17, %v987_v52  ;;  %v2759_v48 = vadd.f32 %v2755_v43, %v2616_v46 }
 0x13b   : > { %v1419_v30 = vadd.f32 %v2725_v12, %v2721_v18  ;;  %v2746_v19 = vmul.f32 %v2743_v42, %v989_v62  ;;  %v2763_v2 = vadd.f32 %v1881_v3, %v2621_v58  ;;  %v2772_v34 = vadd.f32 %v2737_v16, %v988_v60 }
 0x13c   : > { %3026 = vst [vmem:[#allocation18_spill] sm:$0xff] %v2740_v9  ;;  %v2775_v46 = vadd.f32 %v2743_v42, %v989_v62  ;;  %1864 = vrcp.f32 %v2602_v15  ;;  %vm1148_vm7 = vcmask 1047559  }
 0x13d   : > { %3027 = vst [vmem:[#allocation16_spill] sm:$0xff] %v2746_v19  ;;  %v1425_v25 = vadd.f32 %v2763_v2, %v2759_v48  ;;  %1866 = vrcp.f32 %v2580_v14 }
 0x13e   : > { %3029 = vst [vmem:[#allocation17_spill] sm:$0xff] %v2752_v22  ;;  %v1437_v58 = vadd.f32 %v2775_v46, %v2772_v34 }
 0x13f   : > { %1343 = vadd.xlane.f32.xlu2 %v1342_v54  ;;  %v1348_v54 = vadd.f32 %v2746_v19, %v2740_v9  ;;  %3030 = vst [vmem:[#allocation20_spill] sm:$0xff] %v2772_v34 }
 0x140   : > { %1078 = vadd.xlane.f32.xlu1 %v1077_v40  ;;  %3031 = vst [vmem:[#allocation21_spill] sm:$0xff] %v2775_v46  ;;  %v1882_v46 = vld [vmem:[%s2252_s7 + $0x18] sm:$0xff] }
 0x141   : > { %1429 = vadd.xlane.f32.xlu0 %v1428_v38  ;;  %v1434_v38 = vadd.f32 %v2752_v22, %v2749_v20 }
 0x147   : > { %1346 = vadd.xlane.f32.xlu2 %v1345_v21 }
 0x148   : > { %1420 = vadd.xlane.f32.xlu1 %v1419_v30 }
 0x149   : > { %1432 = vadd.xlane.f32.xlu0 %v1431_v13 }
 0x14f   : > { %1349 = vadd.xlane.f32.xlu2 %v1348_v54 }
 0x150   : > { %1426 = vadd.xlane.f32.xlu1 %v1425_v25 }
 0x151   : > { %1435 = vadd.xlane.f32.xlu0 %v1434_v38 }
 0x159   : > { %1438 = vadd.xlane.f32.xlu0 %v1437_v58 }
 0x160   : > { %v607_v40 = vpop.f32.mrf.mxu0  ;;  %v648_v52 = vpop.f32.mrf.mxu1 }
 0x161   : > { %v649_v0 = vadd.f32 %v648_v52, %v607_v40 }
 0x163   : > { %v673_v10 = vmul.f32 3.3567183e-05, %v649_v0 }
 0x165   : > { %v689_v28 = vsub.f32 %v673_v10, %v1877_v36  ;;  %v525_v53 = vpop.f32.mrf.mxu2  ;;  %v566_v56 = vpop.f32.mrf.mxu3 }
 0x166   : > { %v567_v21 = vadd.f32 %v566_v56, %v525_v53 }
 0x167   : > { %v705_v13 = vand.u32 2147483647, %v689_v28 }
 0x168   : > { %v672_v60 = vmul.f32 3.3567183e-05, %v567_v21  ;;  %v610_v30 = vpop.f32.mrf.mxu0  ;;  %v651_v54 = vpop.f32.mrf.mxu1 }
 0x169   : > { %v721_v62 = vmul.f32 5.0, %v705_v13  ;;  %v652_v38 = vadd.f32 %v651_v54, %v610_v30 }
 0x16a   : > { %v688_v25 = vsub.f32 %v672_v60, %v1876_v11  ;;  %v1883_v11 = vld [vmem:[%s2252_s7 + $0x10] sm:$0xff] }
 0x16b   : > { %v675_v19 = vmul.f32 3.3567183e-05, %v652_v38  ;;  %v737_v58 = vadd.f32 1.0, %v721_v62 }
 0x16c   : > { %v704_v9 = vand.u32 2147483647, %v688_v25 }
 0x16d   : > { %v691_v34 = vsub.f32 %v675_v19, %v1882_v46  ;;  %v528_v40 = vpop.f32.mrf.mxu2  ;;  %v569_v52 = vpop.f32.mrf.mxu3  ;;  %v1041_v13 = vmul.f32 %v2725_v12, %v737_v58  ;;  %v1025_v19 = vmul.f32 %v2528_v41, %v737_v58 }
 0x16e   : > { %v720_v0 = vmul.f32 5.0, %v704_v9  ;;  %v570_v36 = vadd.f32 %v569_v52, %v528_v40 }
 0x16f   : > { %v707_v10 = vand.u32 2147483647, %v691_v34 }
 0x170   : > { %v736_v22 = vadd.f32 1.0, %v720_v0  ;;  %v674_v53 = vmul.f32 3.3567183e-05, %v570_v36  ;;  %v613_v28 = vpop.f32.mrf.mxu0  ;;  %v654_v56 = vpop.f32.mrf.mxu1 }
 0x171   : > { %v723_v21 = vmul.f32 5.0, %v707_v10  ;;  %v655_v20 = vadd.f32 %v654_v56, %v613_v28 }
 0x172   : > { %v690_v60 = vsub.f32 %v674_v53, %v1883_v11  ;;  %v1040_v30 = vmul.f32 %v2721_v18, %v736_v22  ;;  %v1024_v54 = vmul.f32 %v2524_v33, %v736_v22 }
 0x173   : > { %v677_v46 = vmul.f32 3.3567183e-05, %v655_v20  ;;  %v739_v38 = vadd.f32 1.0, %v723_v21 }
 0x174   : > { %v706_v9 = vand.u32 2147483647, %v690_v60  ;;  %v1241_v62 = vadd.f32 %v1041_v13, %v1040_v30  ;;  %v1152_v34 = vadd.f32 %v1025_v19, %v1024_v54 }
 0x175   : > { %v693_v25 = vsub.f32 %v677_v46, %v1881_v3  ;;  %v531_v40 = vpop.f32.mrf.mxu2  ;;  %v572_v52 = vpop.f32.mrf.mxu3  ;;  %v1043_v41 = vmul.f32 %v2560_v51, %v739_v38  ;;  %v1027_v56 = vmul.f32 %v2596_v23, %v739_v38 }
 0x176   : > { %v722_v0 = vmul.f32 5.0, %v706_v9  ;;  %v573_v36 = vadd.f32 %v572_v52, %v531_v40  ;;  %1242 = vadd.xlane.f32.xlu1 %v1241_v62  ;;  %1153 = vadd.xlane.f32.xlu2 %v1152_v34  ;;  %v1865_v62 = vpop.eup %1864 }
 0x177   : > { %v709_v12 = vand.u32 2147483647, %v693_v25 }
 0x178   : > { %v738_v10 = vadd.f32 1.0, %v722_v0  ;;  %v676_v53 = vmul.f32 3.3567183e-05, %v573_v36  ;;  %v616_v18 = vpop.f32.mrf.mxu0  ;;  %v657_v28 = vpop.f32.mrf.mxu1 }
 0x179   : > { %v725_v33 = vmul.f32 5.0, %v709_v12  ;;  %v658_v22 = vadd.f32 %v657_v28, %v616_v18  ;;  %v1867_v0 = vpop.eup %1866  ;;  %v975_v18 = vmul.f32 %v1865_v62, %v2588_v50 }
 0x17a   : > { %v692_v20 = vsub.f32 %v676_v53, %v2755_v43  ;;  %v1042_v58 = vmul.f32 %v2555_v6, %v738_v10  ;;  %v1026_v3 = vmul.f32 %v2593_v8, %v738_v10 }
 0x17b   : > { %v679_v21 = vmul.f32 3.3567183e-05, %v658_v22  ;;  %v741_v30 = vadd.f32 1.0, %v725_v33 }
 0x17c   : > { %v708_v13 = vand.u32 2147483647, %v692_v20  ;;  %v1244_v11 = vadd.f32 %v1043_v41, %v1042_v58  ;;  %v1155_v60 = vadd.f32 %v1027_v56, %v1026_v3  ;;  %v991_v3 = vsel %vm959_vm15, %v1865_v62, %v975_v18 }
 0x17d   : > { %v695_v54 = vsub.f32 %v679_v21, %v2655_v31  ;;  %v534_v51 = vpop.f32.mrf.mxu2  ;;  %v575_v19 = vpop.f32.mrf.mxu3  ;;  %v1029_v25 = vmul.f32 %v2631_v59, %v741_v30  ;;  %v1045_v52 = vmul.f32 %v2763_v2, %v741_v30 }
 0x17e   : > { %v724_v43 = vmul.f32 5.0, %v708_v13  ;;  %v576_v46 = vadd.f32 %v575_v19, %v534_v51  ;;  %1245 = vadd.xlane.f32.xlu2 %v1244_v11  ;;  %1156 = vadd.xlane.f32.xlu0 %v1155_v60  ;;  %v2804_v13 = vpop.xlane.xlu2 %1069 }
 0x17f   : > { %v711_v6 = vand.u32 2147483647, %v695_v54  ;;  %v2811_v54 = vmul.f32 %v2640_v55, %v991_v3 }
 0x180   : > { %v740_v8 = vadd.f32 1.0, %v724_v43  ;;  %v678_v23 = vmul.f32 3.3567183e-05, %v576_v46  ;;  %v619_v9 = vpop.f32.mrf.mxu0  ;;  %v660_v15 = vpop.f32.mrf.mxu1 }
 0x181   : > { %v727_v34 = vmul.f32 5.0, %v711_v6  ;;  %v661_v38 = vadd.f32 %v660_v15, %v619_v9 }
 0x182   : > { %v694_v14 = vsub.f32 %v678_v23, %v2649_v26  ;;  %v1028_v31 = vmul.f32 %v2627_v7, %v740_v8  ;;  %v1044_v40 = vmul.f32 %v2759_v48, %v740_v8  ;;  %v974_v48 = vmul.f32 %v1867_v0, %v2572_v32  ;;  %v2813_v46 = vpop.xlane.xlu0 %1057 }
 0x183   : > { %v681_v36 = vmul.f32 3.3567183e-05, %v661_v38  ;;  %v743_v28 = vadd.f32 1.0, %v727_v34 }
 0x184   : > { %v710_v12 = vand.u32 2147483647, %v694_v14  ;;  %v1158_v10 = vadd.f32 %v1029_v25, %v1028_v31  ;;  %v1247_v53 = vadd.f32 %v1045_v52, %v1044_v40  ;;  %v990_v1 = vsel %vm958_vm0, %v1867_v0, %v974_v48 }
 0x185   : > { %v697_v33 = vsub.f32 %v681_v36, %v2676_v24  ;;  %v537_v22 = vpop.f32.mrf.mxu2  ;;  %v578_v59 = vpop.f32.mrf.mxu3  ;;  %v1047_v21 = vmul.f32 %v2686_v27, %v743_v28  ;;  %v1031_v35 = vmul.f32 %v2658_v37, %v743_v28  ;;  %v2816_v27 = vmul.f32 %v2634_v47, %v990_v1 }
 0x186   : > { %v726_v26 = vmul.f32 5.0, %v710_v12  ;;  %v579_v7 = vadd.f32 %v578_v59, %v537_v22  ;;  %1159 = vadd.xlane.f32.xlu1 %v1158_v10  ;;  %1248 = vadd.xlane.f32.xlu0 %v1247_v53  ;;  %v2831_v10 = vadd.f32 %v2634_v47, %v990_v1  ;;  %v2834_v53 = vadd.f32 %v2640_v55, %v991_v3 }
 0x187   : > { %v713_v2 = vand.u32 2147483647, %v697_v33  ;;  %v2821_v37 = vadd.f32 %v2811_v54, %v2816_v27 }
 0x188   : > { %v742_v41 = vadd.f32 1.0, %v726_v26  ;;  %v680_v20 = vmul.f32 3.3567183e-05, %v579_v7  ;;  %v622_v58 = vpop.f32.mrf.mxu0  ;;  %v663_v50 = vpop.f32.mrf.mxu1 }
 0x189   : > { %v729_v56 = vmul.f32 5.0, %v713_v2  ;;  %v664_v24 = vadd.f32 %v663_v50, %v622_v58 }
 0x18a   : > { %v696_v11 = vsub.f32 %v680_v20, %v2666_v57  ;;  %v1046_v60 = vmul.f32 %v2683_v39, %v742_v41  ;;  %v1030_v32 = vmul.f32 %v2652_v29, %v742_v41 }
 0x18b   : > { %v683_v30 = vmul.f32 3.3567183e-05, %v664_v24  ;;  %v745_v6 = vadd.f32 1.0, %v729_v56 }
 0x18c   : > { %v712_v51 = vand.u32 2147483647, %v696_v11  ;;  %v1250_v19 = vadd.f32 %v1047_v21, %v1046_v60  ;;  %v1161_v43 = vadd.f32 %v1031_v35, %v1030_v32  ;;  %v1080_v21 = vrot.slane %v2813_v46, 4 }
 0x18d   : > { %v699_v57 = vsub.f32 %v683_v30, %v2709_v17  ;;  %v540_v39 = vpop.f32.mrf.mxu2  ;;  %v581_v8 = vpop.f32.mrf.mxu3  ;;  %v1049_v14 = vmul.f32 %v2716_v45, %v745_v6  ;;  %v1033_v17 = vmul.f32 %v2680_v4, %v745_v6 }
 0x18e   : > { %v728_v29 = vmul.f32 5.0, %v712_v51  ;;  %v582_v23 = vadd.f32 %v581_v8, %v540_v39  ;;  %1251 = vadd.xlane.f32.xlu1 %v1250_v19  ;;  %1162 = vadd.xlane.f32.xlu2 %v1161_v43 }
 0x18f   : > { %v715_v9 = vand.u32 2147483647, %v699_v57 }
 0x190   : > { %v744_v15 = vadd.f32 1.0, %v728_v29  ;;  %v682_v62 = vmul.f32 3.3567183e-05, %v582_v23  ;;  %v625_v34 = vpop.f32.mrf.mxu0  ;;  %v666_v38 = vpop.f32.mrf.mxu1  ;;  %v3032_v29 = vld [vmem:[#allocation19_spill] sm:$0xff] }
 0x191   : > { %v667_v25 = vadd.f32 %v666_v38, %v625_v34  ;;  %v731_v31 = vmul.f32 5.0, %v715_v9  ;;  %v2828_v12 = vpop.xlane.xlu2 %1072  ;;  %v3034_v38 = vld [vmem:[#allocation18_spill] sm:$0xff] }
 0x192   : > { %v698_v40 = vsub.f32 %v682_v62, %v2699_v5  ;;  %v1048_v52 = vmul.f32 %v2706_v61, %v744_v15  ;;  %v1032_v0 = vmul.f32 %v2670_v63, %v744_v15  ;;  %v2839_v61 = vadd.f32 %v2834_v53, %v2831_v10  ;;  %v3033_v62 = vld [vmem:[#allocation17_spill] sm:$0xff] }
 0x193   : > { %v685_v36 = vmul.f32 3.3567183e-05, %v667_v25  ;;  %v747_v63 = vadd.f32 1.0, %v731_v31  ;;  %v1104_v31 = vrot.slane %v2804_v13, 4 }
 0x194   : > { %v714_v18 = vand.u32 2147483647, %v698_v40  ;;  %v1253_v45 = vadd.f32 %v1049_v14, %v1048_v52  ;;  %v1164_v28 = vadd.f32 %v1033_v17, %v1032_v0  ;;  %v1061_v7 = vpop.xlane.xlu0 %1060  ;;  %v3035_v14 = vld [vmem:[#allocation16_spill] sm:$0xff] }
 0x195   : > { %v701_v4 = vsub.f32 %v685_v36, %v2743_v42  ;;  %v543_v33 = vpop.f32.mrf.mxu2  ;;  %v584_v5 = vpop.f32.mrf.mxu3  ;;  %v1035_v56 = vmul.f32 %v2712_v49, %v747_v63  ;;  %v1086_v57 = vrot.slane %v1061_v7, 4  ;;  %v1051_v34 = vmul.f32 %v3033_v62, %v747_v63 }
 0x196   : > { %v730_v22 = vmul.f32 5.0, %v714_v18  ;;  %v585_v59 = vadd.f32 %v584_v5, %v543_v33  ;;  %1254 = vadd.xlane.f32.xlu1 %v1253_v45  ;;  %1165 = vadd.xlane.f32.xlu0 %v1164_v28  ;;  %v3036_v5 = vld [vmem:[#allocation20_spill] sm:$0xff] }
 0x197   : > { %v717_v26 = vand.u32 2147483647, %v701_v4  ;;  %v1110_v4 = vrot.slane %v2828_v12, 4 }
 0x198   : > { %v746_v48 = vadd.f32 1.0, %v730_v22  ;;  %v684_v2 = vmul.f32 3.3567183e-05, %v585_v59  ;;  %v628_v41 = vpop.f32.mrf.mxu0  ;;  %v669_v20 = vpop.f32.mrf.mxu1 }
 0x199   : > { %v670_v58 = vadd.f32 %v669_v20, %v628_v41  ;;  %v733_v50 = vmul.f32 5.0, %v717_v26  ;;  %v1332_v60 = vpop.xlane.xlu2 %1331  ;;  %v3037_v41 = vld [vmem:[#allocation21_spill] sm:$0xff] }
 0x19a   : > { %v700_v42 = vsub.f32 %v684_v2, %v2737_v16  ;;  %v1034_v3 = vmul.f32 %v2702_v44, %v746_v48  ;;  %v1354_v6 = vrot.slane %v1332_v60, 4  ;;  %v1081_v44 = vadd.f32 %v1080_v21, %v2813_v46 }
 0x19b   : > { %v687_v24 = vmul.f32 3.3567183e-05, %v670_v58  ;;  %v749_v51 = vadd.f32 1.0, %v733_v50  ;;  %v1050_v23 = vmul.f32 %v3032_v29, %v746_v48  ;;  %v1087_v46 = vadd.f32 %v1086_v57, %v1061_v7 }
 0x19c   : > { %v716_v1 = vand.u32 2147483647, %v700_v42  ;;  %v1167_v11 = vadd.f32 %v1035_v56, %v1034_v3  ;;  %v1076_v49 = vpop.xlane.xlu0 %1075  ;;  %v1355_v9 = vadd.f32 %v1354_v6, %v1332_v60  ;;  %v1082_v40 = vrot.slane %v1081_v44, 2 }
 0x19d   : > { %v703_v32 = vsub.f32 %v687_v24, %v2640_v55  ;;  %v546_v35 = vpop.f32.mrf.mxu2  ;;  %v587_v30 = vpop.f32.mrf.mxu3  ;;  %v1037_v17 = vmul.f32 %v3035_v14, %v749_v51  ;;  %v1256_v0 = vadd.f32 %v1051_v34, %v1050_v23  ;;  %v1088_v33 = vrot.slane %v1087_v46, 2 }
 0x19e   : > { %v732_v19 = vmul.f32 5.0, %v716_v1  ;;  %v588_v43 = vadd.f32 %v587_v30, %v546_v35  ;;  %1168 = vadd.xlane.f32.xlu1 %v1167_v11  ;;  %v1356_v18 = vrot.slane %v1355_v9, 2  ;;  %v1083_v26 = vadd.f32 %v1082_v40, %v1081_v44 }
 0x19f   : > { %v719_v16 = vand.u32 2147483647, %v703_v32  ;;  %v1053_v20 = vmul.f32 %v3037_v41, %v749_v51  ;;  %v1116_v50 = vrot.slane %v1076_v49, 4  ;;  %v1111_v21 = vadd.f32 %v1110_v4, %v2828_v12 }
 0x1a0   : > { %v748_v39 = vadd.f32 1.0, %v732_v19  ;;  %v686_v8 = vmul.f32 3.3567183e-05, %v588_v43  ;;  %v1357_v48 = vadd.f32 %v1356_v18, %v1355_v9  ;;  %v1089_v1 = vadd.f32 %v1088_v33, %v1087_v46 }
 0x1a1   : > { %v735_v15 = vmul.f32 5.0, %v719_v16  ;;  %v1112_v6 = vrot.slane %v1111_v21, 2 }
 0x1a2   : > { %v702_v55 = vsub.f32 %v686_v8, %v2634_v47  ;;  %v1036_v25 = vmul.f32 %v3034_v38, %v748_v39  ;;  %v1105_v47 = vadd.f32 %v1104_v31, %v2804_v13  ;;  %v1052_v63 = vmul.f32 %v3036_v5, %v748_v39 }
 0x1a3   : > { %v751_v45 = vadd.f32 1.0, %v735_v15  ;;  %v1064_v7 = vpop.xlane.xlu1 %1063  ;;  %v1358_v35 = vrot.slane %v1357_v48, 1 }
 0x1a4   : > { %v718_v52 = vand.u32 2147483647, %v702_v55  ;;  %v1170_v36 = vadd.f32 %v1037_v17, %v1036_v25  ;;  %v1335_v22 = vpop.xlane.xlu0 %1334  ;;  %v1092_v42 = vrot.slane %v1064_v7, 4  ;;  %v1259_v11 = vadd.f32 %v1053_v20, %v1052_v63 }
 0x1a5   : > { %v1360_v2 = vrot.slane %v1335_v22, 4  ;;  %v1039_v58 = vmul.f32 %v2811_v54, %v751_v45  ;;  %v1055_v56 = vmul.f32 %v2834_v53, %v751_v45  ;;  %v1106_v54 = vrot.slane %v1105_v47, 2 }
 0x1a6   : > { %v734_v28 = vmul.f32 5.0, %v718_v52  ;;  %1257 = vadd.xlane.f32.xlu1 %v1256_v0  ;;  %1171 = vadd.xlane.f32.xlu2 %v1170_v36  ;;  %v1093_v60 = vadd.f32 %v1092_v42, %v1064_v7  ;;  %v1090_v53 = vrot.slane %v1089_v1, 1  ;;  %v1359_v12 = vadd.f32 %v1358_v35, %v1357_v48 }
 0x1a7   : > { %v1361_v24 = vadd.f32 %v1360_v2, %v1335_v22  ;;  %v1107_v8 = vadd.f32 %v1106_v54, %v1105_v47  ;;  %v1113_v55 = vadd.f32 %v1112_v6, %v1111_v21 }
 0x1a8   : > { %v750_v59 = vadd.f32 1.0, %v734_v28  ;;  %v1094_v19 = vrot.slane %v1093_v60, 2  ;;  %v1091_v62 = vadd.f32 %v1090_v53, %v1089_v1 }
 0x1a9   : > { %v1362_v51 = vrot.slane %v1361_v24, 2  ;;  %v1108_v14 = vrot.slane %v1107_v8, 1  ;;  %v1114_v40 = vrot.slane %v1113_v55, 1 }
 0x1aa   : > { %v1038_v3 = vmul.f32 %v2816_v27, %v750_v59  ;;  %v1054_v13 = vmul.f32 %v2831_v10, %v750_v59  ;;  %v1117_v27 = vadd.f32 %v1116_v50, %v1076_v49  ;;  %v1084_v10 = vrot.slane %v1083_v26, 1  ;;  %v1424_v49 = vpop.xlane.xlu2 %1423 }
 0x1ab   : > { %v1363_v43 = vadd.f32 %v1362_v51, %v1361_v24  ;;  %v1095_v16 = vadd.f32 %v1094_v19, %v1093_v60  ;;  %v1067_v57 = vpop.xlane.xlu1 %1066  ;;  %v1449_v38 = vrot.slane %v1424_v49, 4  ;;  %v1109_v28 = vadd.f32 %v1108_v14, %v1107_v8 }
 0x1ac   : > { %v1173_v32 = vadd.f32 %v1039_v58, %v1038_v3  ;;  %v1262_v30 = vadd.f32 %v1055_v56, %v1054_v13  ;;  %v1098_v39 = vrot.slane %v1067_v57, 4  ;;  %v1118_v29 = vrot.slane %v1117_v27, 2 }
 0x1ad   : > { %v1364_v44 = vrot.slane %v1363_v43, 1  ;;  %v1096_v23 = vrot.slane %v1095_v16, 1  ;;  %v1085_v15 = vadd.f32 %v1084_v10, %v1083_v26  ;;  %v1450_v36 = vadd.f32 %v1449_v38, %v1424_v49 }
 0x1ae   : > { %1260 = vadd.xlane.f32.xlu1 %v1259_v11  ;;  %1352 = vadd.xlane.f32.xlu2 %v2821_v37  ;;  %v1099_v37 = vadd.f32 %v1098_v39, %v1067_v57  ;;  %v1119_v17 = vadd.f32 %v1118_v29, %v1117_v27  ;;  %v1115_v33 = vadd.f32 %v1114_v40, %v1113_v55 }
 0x1af   : > { %1174 = vadd.xlane.f32.xlu0 %v1173_v32  ;;  %v1365_v9 = vadd.f32 %v1364_v44, %v1363_v43  ;;  %v1097_v31 = vadd.f32 %v1096_v23, %v1095_v16  ;;  %v1137_v46 = vsel %vm1136_vm1, %v1091_v62, %v1085_v15  ;;  %v1451_v22 = vrot.slane %v1450_v36, 2 }
 0x1b0   : > { %v1100_v25 = vrot.slane %v1099_v37, 2  ;;  %v1120_v47 = vrot.slane %v1119_v17, 1 }
 0x1b1   : > { %v2864_v34 = vsel %vm1136_vm1, %v1365_v9, %v1359_v12  ;;  %v1139_v4 = vsel %vm1138_vm2, %v1097_v31, %v1137_v46  ;;  %v1452_v20 = vadd.f32 %v1451_v22, %v1450_v36 }
 0x1b2   : > { %v1101_v52 = vadd.f32 %v1100_v25, %v1099_v37  ;;  %v1121_v26 = vadd.f32 %v1120_v47, %v1119_v17  ;;  %v1341_v51 = vpop.xlane.xlu2 %1340 }
 0x1b3   : > { %v1079_v0 = vpop.xlane.xlu1 %1078  ;;  %v1453_v56 = vrot.slane %v1452_v20, 1  ;;  %v1372_v44 = vrot.slane %v1341_v51, 4 }
 0x1b4   : > { %v1102_v18 = vrot.slane %v1101_v52, 1  ;;  %v1122_v45 = vrot.slane %v1079_v0, 4 }
 0x1b5   : > { %v1454_v11 = vadd.f32 %v1453_v56, %v1452_v20  ;;  %v1373_v23 = vadd.f32 %v1372_v44, %v1341_v51 }
 0x1b6   : > { %1263 = vadd.xlane.f32.xlu1 %v1262_v30  ;;  %v1103_v5 = vadd.f32 %v1102_v18, %v1101_v52  ;;  %v1123_v63 = vadd.f32 %v1122_v45, %v1079_v0  ;;  %v1338_v30 = vpop.xlane.xlu0 %1337 }
 0x1b7   : > { %1441 = vadd.xlane.f32.xlu0 %v2839_v61  ;;  %v1366_v16 = vrot.slane %v1338_v30, 4  ;;  %v1374_v62 = vrot.slane %v1373_v23, 2 }
 0x1b8   : > { %v1141_v59 = vsel %vm1140_vm3, %v1103_v5, %v1139_v4  ;;  %v1124_v61 = vrot.slane %v1123_v63, 2 }
 0x1b9   : > { %v1143_v48 = vsel %vm1142_vm4, %v1109_v28, %v1141_v59  ;;  %v1367_v39 = vadd.f32 %v1366_v16, %v1338_v30  ;;  %v1375_v46 = vadd.f32 %v1374_v62, %v1373_v23 }
 0x1ba   : > { %v1125_v7 = vadd.f32 %v1124_v61, %v1123_v63  ;;  %v1145_v2 = vsel %vm1144_vm5, %v1115_v33, %v1143_v48  ;;  %v1344_v54 = vpop.xlane.xlu2 %1343 }
 0x1bb   : > { %v1421_v41 = vpop.xlane.xlu1 %1420  ;;  %v1147_v42 = vsel %vm1146_vm6, %v1121_v26, %v1145_v2  ;;  %v1378_v29 = vrot.slane %v1344_v54, 4  ;;  %v1368_v9 = vrot.slane %v1367_v39, 2  ;;  %v1376_v4 = vrot.slane %v1375_v46, 1 }
 0x1bc   : > { %v1126_v58 = vrot.slane %v1125_v7, 1  ;;  %v1443_v50 = vrot.slane %v1421_v41, 4 }
 0x1bd   : > { %v1379_v15 = vadd.f32 %v1378_v29, %v1344_v54  ;;  %v1369_v38 = vadd.f32 %v1368_v9, %v1367_v39  ;;  %v1377_v20 = vadd.f32 %v1376_v4, %v1375_v46 }
 0x1be   : > { %v1127_v3 = vadd.f32 %v1126_v58, %v1125_v7  ;;  %v1444_v13 = vadd.f32 %v1443_v50, %v1421_v41  ;;  %v1430_v19 = vpop.xlane.xlu0 %1429 }
 0x1bf   : > { %v1461_v25 = vrot.slane %v1430_v19, 4  ;;  %v1380_v17 = vrot.slane %v1379_v15, 2  ;;  %v1370_v0 = vrot.slane %v1369_v38, 1 }
 0x1c0   : > { %v1149_v24 = vsel %vm1148_vm7, %v1127_v3, %v1147_v42  ;;  %v1445_v21 = vrot.slane %v1444_v13, 2 }
 0x1c1   : > { %1151 = vst [vmem:[%s2875_s8] sm:$0xff] %v1149_v24  ;;  %v1462_v18 = vadd.f32 %v1461_v25, %v1430_v19  ;;  %v1381_v45 = vadd.f32 %v1380_v17, %v1379_v15  ;;  %v1371_v5 = vadd.f32 %v1370_v0, %v1369_v38 }
 0x1c2   : > { %v1446_v1 = vadd.f32 %v1445_v21, %v1444_v13  ;;  %v1347_v10 = vpop.xlane.xlu2 %1346 }
 0x1c3   : > { %v1427_v43 = vpop.xlane.xlu1 %1426  ;;  %v1384_v37 = vrot.slane %v1347_v10, 4  ;;  %v1463_v61 = vrot.slane %v1462_v18, 2  ;;  %v1382_v7 = vrot.slane %v1381_v45, 1  ;;  %v1411_v42 = vsel %vm1138_vm2, %v1371_v5, %v2864_v34 }
 0x1c4   : > { %v1447_v60 = vrot.slane %v1446_v1, 1  ;;  %v1455_v40 = vrot.slane %v1427_v43, 4  ;;  %v1412_v30 = vsel %vm1140_vm3, %v1377_v20, %v1411_v42 }
 0x1c5   : > { %v1385_v52 = vadd.f32 %v1384_v37, %v1347_v10  ;;  %v1464_v24 = vadd.f32 %v1463_v61, %v1462_v18 }
 0x1c6   : > { %v1448_v32 = vadd.f32 %v1447_v60, %v1446_v1  ;;  %v1433_v27 = vpop.xlane.xlu0 %1432  ;;  %v1456_v47 = vadd.f32 %v1455_v40, %v1427_v43  ;;  %v1383_v1 = vadd.f32 %v1382_v7, %v1381_v45 }
 0x1c7   : > { %v1467_v31 = vrot.slane %v1433_v27, 4  ;;  %v1386_v33 = vrot.slane %v1385_v52, 2  ;;  %v1465_v16 = vrot.slane %v1464_v24, 1 }
 0x1c8   : > { %v2879_v35 = vsel %vm1136_vm1, %v1454_v11, %v1448_v32  ;;  %v1457_v41 = vrot.slane %v1456_v47, 2  ;;  %v1413_v29 = vsel %vm1142_vm4, %v1383_v1, %v1412_v30 }
 0x1c9   : > { %v1468_v28 = vadd.f32 %v1467_v31, %v1433_v27  ;;  %v1387_v58 = vadd.f32 %v1386_v33, %v1385_v52  ;;  %v1466_v0 = vadd.f32 %v1465_v16, %v1464_v24 }
 0x1ca   : > { %v1350_v12 = vpop.xlane.xlu2 %1349  ;;  %v1458_v60 = vadd.f32 %v1457_v41, %v1456_v47 }
 0x1cb   : > { %v1390_v36 = vrot.slane %v1350_v12, 4  ;;  %v1469_v2 = vrot.slane %v1468_v28, 2  ;;  %v1388_v51 = vrot.slane %v1387_v58, 1 }
 0x1cc   : > { %v1459_v9 = vrot.slane %v1458_v60, 1 }
 0x1cd   : > { %v1391_v63 = vadd.f32 %v1390_v36, %v1350_v12  ;;  %v1470_v11 = vadd.f32 %v1469_v2, %v1468_v28  ;;  %v1389_v62 = vadd.f32 %v1388_v51, %v1387_v58 }
 0x1ce   : > { %v1436_v6 = vpop.xlane.xlu0 %1435  ;;  %v1460_v18 = vadd.f32 %v1459_v9, %v1458_v60 }
 0x1cf   : > { %v1473_v22 = vrot.slane %v1436_v6, 4  ;;  %v1392_v3 = vrot.slane %v1391_v63, 2  ;;  %v1471_v23 = vrot.slane %v1470_v11, 1 }
 0x1d0   : > { %v1500_v20 = vsel %vm1138_vm2, %v1460_v18, %v2879_v35 }
 0x1d1   : > { %v1474_v13 = vadd.f32 %v1473_v22, %v1436_v6  ;;  %v1393_v54 = vadd.f32 %v1392_v3, %v1391_v63  ;;  %v2899_v36 = vadd.f32 %v1471_v23, %v1470_v11 }
 0x1d3   : > { %v1475_v27 = vrot.slane %v1474_v13, 2  ;;  %v1394_v25 = vrot.slane %v1393_v54, 1 }
 0x1d5   : > { %v1395_v33 = vadd.f32 %v1394_v25, %v1393_v54 }
 0x1d6   : > { %v2881_v57 = vpop.xlane.xlu0 %1438 }
 0x1d7   : > { %v1479_v32 = vrot.slane %v2881_v57, 4 }
 0x1d9   : > { %v1480_v15 = vadd.f32 %v1479_v32, %v2881_v57  ;;  %v1414_v57 = vsel %vm1144_vm5, %v1389_v62, %v1413_v29 }
 0x1da   : > { %v2910_v35 = vsel %vm1146_vm6, %v1395_v33, %v1414_v57 }
 0x1db   : > { %v1481_v45 = vrot.slane %v1480_v15, 2 }
 0x1dd   : > { %v2905_v58 = vadd.f32 %v1481_v45, %v1480_v15 }
 0x1e9   : > { %v1243_v53 = vpop.xlane.xlu1 %1242  ;;  %v1154_v55 = vpop.xlane.xlu2 %1153 }
 0x1ea   : > { %v1265_v50 = vrot.slane %v1243_v53, 4  ;;  %v1176_v56 = vrot.slane %v1154_v55, 4 }
 0x1ec   : > { %v1266_v19 = vadd.f32 %v1265_v50, %v1243_v53  ;;  %v1177_v43 = vadd.f32 %v1176_v56, %v1154_v55  ;;  %v2896_v55 = vadd.f32 %v1475_v27, %v1474_v13 }
 0x1ee   : > { %v1267_v37 = vrot.slane %v1266_v19, 2  ;;  %v1178_v17 = vrot.slane %v1177_v43, 2  ;;  %v1477_v5 = vrot.slane %v2896_v55, 1 }
 0x1f0   : > { %v1268_v28 = vadd.f32 %v1267_v37, %v1266_v19  ;;  %v1179_v63 = vadd.f32 %v1178_v17, %v1177_v43  ;;  %v2913_v19 = vsel %vm1140_vm3, %v1466_v0, %v1500_v20  ;;  %v1483_v43 = vrot.slane %v2905_v58, 1 }
 0x1f1   : > { %v1157_v49 = vpop.xlane.xlu0 %1156  ;;  %v1246_v59 = vpop.xlane.xlu2 %1245 }
 0x1f2   : > { %v1182_v21 = vrot.slane %v1157_v49, 4  ;;  %v1271_v34 = vrot.slane %v1246_v59, 4  ;;  %v1269_v42 = vrot.slane %v1268_v28, 1  ;;  %v1180_v24 = vrot.slane %v1179_v63, 1 }
 0x1f4   : > { %v1183_v12 = vadd.f32 %v1182_v21, %v1157_v49  ;;  %v1272_v49 = vadd.f32 %v1271_v34, %v1246_v59 }
 0x1f6   : > { %v1184_v40 = vrot.slane %v1183_v12, 2  ;;  %v1273_v59 = vrot.slane %v1272_v49, 2 }
 0x1f8   : > { %v1185_v61 = vadd.f32 %v1184_v40, %v1183_v12  ;;  %v1274_v60 = vadd.f32 %v1273_v59, %v1272_v49  ;;  %v2918_v12 = vadd.f32 %v1269_v42, %v1268_v28 }
 0x1f9   : > { %v2883_v8 = vpop.xlane.xlu1 %1159  ;;  %v1249_v26 = vpop.xlane.xlu0 %1248 }
 0x1fa   : > { %v1188_v6 = vrot.slane %v2883_v8, 4  ;;  %v1277_v53 = vrot.slane %v1249_v26, 4  ;;  %v1186_v32 = vrot.slane %v1185_v61, 1  ;;  %v1275_v29 = vrot.slane %v1274_v60, 1 }
 0x1fc   : > { %v1189_v46 = vadd.f32 %v1188_v6, %v2883_v8  ;;  %v1278_v47 = vadd.f32 %v1277_v53, %v1249_v26  ;;  %v1181_v6 = vadd.f32 %v1180_v24, %v1179_v63  ;;  %v1187_v23 = vadd.f32 %v1186_v32, %v1185_v61 }
 0x1fd   : > { %v1276_v45 = vadd.f32 %v1275_v29, %v1274_v60 }
 0x1fe   : > { %v1190_v7 = vrot.slane %v1189_v46, 2  ;;  %v1279_v3 = vrot.slane %v1278_v47, 2  ;;  %v1232_v59 = vsel %vm1136_vm1, %v1187_v23, %v1181_v6 }
 0x200   : > { %v1191_v30 = vadd.f32 %v1190_v7, %v1189_v46 }
 0x201   : > { %v2885_v14 = vpop.xlane.xlu1 %1251  ;;  %v1163_v10 = vpop.xlane.xlu2 %1162 }
 0x202   : > { %v1194_v38 = vrot.slane %v1163_v10, 4  ;;  %v1283_v50 = vrot.slane %v2885_v14, 4  ;;  %v1192_v9 = vrot.slane %v1191_v30, 1 }
 0x204   : > { %v1195_v4 = vadd.f32 %v1194_v38, %v1163_v10  ;;  %v1284_v54 = vadd.f32 %v1283_v50, %v2885_v14  ;;  %v1280_v10 = vadd.f32 %v1279_v3, %v1278_v47  ;;  %v1193_v57 = vadd.f32 %v1192_v9, %v1191_v30 }
 0x206   : > { %v1196_v13 = vrot.slane %v1195_v4, 2  ;;  %v1285_v53 = vrot.slane %v1284_v54, 2 }
 0x208   : > { %v1197_v16 = vadd.f32 %v1196_v13, %v1195_v4  ;;  %v1286_v4 = vadd.f32 %v1285_v53, %v1284_v54 }
 0x209   : > { %v2887_v48 = vpop.xlane.xlu1 %1254  ;;  %v1166_v44 = vpop.xlane.xlu0 %1165 }
 0x20a   : > { %v1200_v31 = vrot.slane %v1166_v44, 4  ;;  %v1289_v56 = vrot.slane %v2887_v48, 4  ;;  %v1198_v49 = vrot.slane %v1197_v16, 1  ;;  %v1287_v24 = vrot.slane %v1286_v4, 1 }
 0x20c   : > { %v1201_v22 = vadd.f32 %v1200_v31, %v1166_v44  ;;  %v1290_v34 = vadd.f32 %v1289_v56, %v2887_v48  ;;  %v1281_v31 = vrot.slane %v1280_v10, 1  ;;  %v1199_v61 = vadd.f32 %v1198_v49, %v1197_v16 }
 0x20d   : > { %v1288_v23 = vadd.f32 %v1287_v24, %v1286_v4 }
 0x20e   : > { %v1202_v21 = vrot.slane %v1201_v22, 2  ;;  %v1291_v40 = vrot.slane %v1290_v34, 2 }
 0x210   : > { %v1203_v44 = vadd.f32 %v1202_v21, %v1201_v22  ;;  %v1292_v7 = vadd.f32 %v1291_v40, %v1290_v34  ;;  %v1484_v40 = vadd.f32 %v1483_v43, %v2905_v58 }
 0x211   : > { %v1169_v39 = vpop.xlane.xlu1 %1168 }
 0x212   : > { %v1206_v52 = vrot.slane %v1169_v39, 4  ;;  %v1204_v46 = vrot.slane %v1203_v44, 1  ;;  %v1293_v30 = vrot.slane %v1292_v7, 1 }
 0x214   : > { %v1207_v8 = vadd.f32 %v1206_v52, %v1169_v39  ;;  %v1294_v53 = vadd.f32 %v1293_v30, %v1292_v7 }
 0x216   : > { %v1208_v51 = vrot.slane %v1207_v8, 2 }
 0x218   : > { %v1209_v15 = vadd.f32 %v1208_v51, %v1207_v8 }
 0x219   : > { %v1258_v2 = vpop.xlane.xlu1 %1257  ;;  %v1172_v41 = vpop.xlane.xlu2 %1171 }
 0x21a   : > { %v1212_v26 = vrot.slane %v1172_v41, 4  ;;  %v1295_v1 = vrot.slane %v1258_v2, 4  ;;  %v1210_v28 = vrot.slane %v1209_v15, 1 }
 0x21c   : > { %v1213_v11 = vadd.f32 %v1212_v26, %v1172_v41  ;;  %v1296_v39 = vadd.f32 %v1295_v1, %v1258_v2  ;;  %v1282_v2 = vadd.f32 %v1281_v31, %v1280_v10  ;;  %v1205_v41 = vadd.f32 %v1204_v46, %v1203_v44 }
 0x21d   : > { %v1233_v26 = vsel %vm1138_vm2, %v1193_v57, %v1232_v59  ;;  %v1211_v42 = vadd.f32 %v1210_v28, %v1209_v15 }
 0x21e   : > { %v1214_v27 = vrot.slane %v1213_v11, 2  ;;  %v1297_v52 = vrot.slane %v1296_v39, 2  ;;  %v1234_v32 = vsel %vm1140_vm3, %v1199_v61, %v1233_v26 }
 0x220   : > { %v1215_v14 = vadd.f32 %v1214_v27, %v1213_v11  ;;  %v1298_v20 = vadd.f32 %v1297_v52, %v1296_v39  ;;  %v1235_v27 = vsel %vm1142_vm4, %v1205_v41, %v1234_v32 }
 0x221   : > { %v1261_v62 = vpop.xlane.xlu1 %1260  ;;  %v1353_v37 = vpop.xlane.xlu2 %1352  ;;  %v1236_v6 = vsel %vm1144_vm5, %v1211_v42, %v1235_v27 }
 0x222   : > { %v1301_v38 = vrot.slane %v1261_v62, 4  ;;  %v1396_v25 = vrot.slane %v1353_v37, 4  ;;  %v1175_v17 = vpop.xlane.xlu0 %1174  ;;  %v1216_v33 = vrot.slane %v1215_v14, 1  ;;  %v1299_v10 = vrot.slane %v1298_v20, 1 }
 0x223   : > { %v1218_v48 = vrot.slane %v1175_v17, 4 }
 0x224   : > { %v1302_v0 = vadd.f32 %v1301_v38, %v1261_v62  ;;  %v1397_v18 = vadd.f32 %v1396_v25, %v1353_v37  ;;  %v1217_v21 = vadd.f32 %v1216_v33, %v1215_v14  ;;  %v1478_v37 = vadd.f32 %v1477_v5, %v2896_v55 }
 0x225   : > { %v1219_v47 = vadd.f32 %v1218_v48, %v1175_v17  ;;  %v1502_v25 = vsel %vm1142_vm4, %v2899_v36, %v2913_v19  ;;  %v1321_v17 = vsel %vm1136_vm1, %v1276_v45, %v2918_v12  ;;  %v1300_v31 = vadd.f32 %v1299_v10, %v1298_v20 }
 0x226   : > { %v1303_v63 = vrot.slane %v1302_v0, 2  ;;  %v1398_v22 = vrot.slane %v1397_v18, 2  ;;  %v1237_v9 = vsel %vm1146_vm6, %v1217_v21, %v1236_v6  ;;  %v1322_v55 = vsel %vm1138_vm2, %v1282_v2, %v1321_v17 }
 0x227   : > { %v1220_v8 = vrot.slane %v1219_v47, 2  ;;  %v1323_v36 = vsel %vm1140_vm3, %v1288_v23, %v1322_v55  ;;  %v1503_v12 = vsel %vm1144_vm5, %v1478_v37, %v1502_v25 }
 0x228   : > { %v1399_v50 = vadd.f32 %v1398_v22, %v1397_v18  ;;  %v1304_v3 = vadd.f32 %v1303_v63, %v1302_v0  ;;  %v1324_v48 = vsel %vm1142_vm4, %v1294_v53, %v1323_v36  ;;  %v1504_v43 = vsel %vm1146_vm6, %v1484_v40, %v1503_v12 }
 0x229   : > { %v1221_v13 = vadd.f32 %v1220_v8, %v1219_v47  ;;  %v1264_v56 = vpop.xlane.xlu1 %1263  ;;  %v1325_v52 = vsel %vm1144_vm5, %v1300_v31, %v1324_v48 }
 0x22a   : > { %v1400_v1 = vrot.slane %v1399_v50, 1  ;;  %v1307_v11 = vrot.slane %v1264_v56, 4  ;;  %v1442_v60 = vpop.xlane.xlu0 %1441  ;;  %v1305_v44 = vrot.slane %v1304_v3, 1 }
 0x22b   : > { %v1222_v51 = vrot.slane %v1221_v13, 1  ;;  %v1485_v54 = vrot.slane %v1442_v60, 4 }
 0x22c   : > { %v1401_v16 = vadd.f32 %v1400_v1, %v1399_v50  ;;  %v1308_v34 = vadd.f32 %v1307_v11, %v1264_v56  ;;  %v1306_v5 = vadd.f32 %v1305_v44, %v1304_v3 }
 0x22d   : > { %v1223_v39 = vadd.f32 %v1222_v51, %v1221_v13  ;;  %v1486_v29 = vadd.f32 %v1485_v54, %v1442_v60 }
 0x22e   : > { %v1416_v15 = vsel %vm1148_vm7, %v1401_v16, %v2910_v35  ;;  %v1309_v62 = vrot.slane %v1308_v34, 2  ;;  %v1326_v18 = vsel %vm1146_vm6, %v1306_v5, %v1325_v52 }
 0x22f   : > { %1418 = vst [vmem:[%s2875_s8 + $0x18] sm:$0xff] %v1416_v15  ;;  %v1238_v14 = vsel %vm1148_vm7, %v1223_v39, %v1237_v9  ;;  %v1487_v38 = vrot.slane %v1486_v29, 2 }
 0x230   : > { %1240 = vst [vmem:[%s2875_s8 + $0x8] sm:$0xff] %v1238_v14  ;;  %v1310_v35 = vadd.f32 %v1309_v62, %v1308_v34 }
 0x231   : > { %v1488_v49 = vadd.f32 %v1487_v38, %v1486_v29 }
 0x232   : > { %v1311_v19 = vrot.slane %v1310_v35, 1 }
 0x233   : > { %v1489_v46 = vrot.slane %v1488_v49, 1 }
 0x234   : > { %v1312_v0 = vadd.f32 %v1311_v19, %v1310_v35 }
 0x235   : > { %v1490_v58 = vadd.f32 %v1489_v46, %v1488_v49 }
 0x236   : > { %v1327_v45 = vsel %vm1148_vm7, %v1312_v0, %v1326_v18 }
 0x237   : > { %1329 = vst [vmem:[%s2875_s8 + $0x10] sm:$0xff] %v1327_v45  ;;  %v1505_v57 = vsel %vm1148_vm7, %v1490_v58, %v1504_v43 }
 0x238   : > { %1507 = vst [vmem:[%s2875_s8 + $0x20] sm:$0xff] %v1505_v57 }
 0x239   : > { %2031 = shalt.err (!%p2028_p10)
}
 0x23a   : > { %1708 = dma.vmem_to_hbm [thread:$0]  (%p2186_p3), %s1523_s29, 640, %s1525_s30, %s1509_s9  }
 0x23b PF: > { %p1733_p11 = scmp.ge.s32.totalorder %s2082_s18, 2  ;;  %s1536_s25 = sand.u32 1, %s2070_s15  }
 0x23c   : > { %s1537_s6 = scalar_lea.sflag [#allocation4], %s1536_s25 }
 0x23d   : > { %p1725_p12 = pnand %p1733_p11, %p2150_p6 }
 0x23f   : > { %p1726_p13 = pneg %p1725_p12 }
 0x241   : > { %2065 = dma.done.wait (%p1726_p13), %s1537_s6, 640  }
 0x242   : > { %2067 = vsyncadd (%p1726_p13), %s1537_s6, 4294966656  ;;  %p21_p0 = scmp.ge.s32.totalorder %s2173_s12, 10   ;;  %s3038_s15 = smov %s2074_s16 }
 0x243   : > { %s3039_s16 = smov %s2078_s17  ;;  %s3040_s17 = smov %s2182_s20 }
 0x244   : > { %s3041_s18 = smov %s2173_s12  ;;  %23 = sbr.rel (!%p21_p0) target bundleno = 12 (0xc), region = 102 }
 0x249   :  { %1543 = vsyncpa [#allocation3], 1 }
 0x24a   :  { %1545 = vsyncpa [#allocation3 + $0x1], 1 }
 0x24b   :  { %1546 = vsyncpa [#allocation6], 1 }
 0x24c   :  { %1548 = vsyncpa [#allocation6 + $0x1], 1 }
 0x24d   :  { %1549 = vsyncpa [#allocation9], 1 }
 0x24e   :  { %1550 = vsyncpa [#allocation4], 1 }
 0x24f   :  { %1552 = vsyncpa [#allocation4 + $0x1], 1 }

</bundles_post_ra>
